<compile_context>
chip_gen: v7x
topology: tpu7x:2x2x1
jax: 0.10.0
libtpu: 0.0.40
codegen_flags: <defaults>
</compile_context>

<pallas_src>
import functools
import math

import jax
import jax.numpy as jnp
from jax.experimental import pallas as pl
from jax.experimental.pallas import tpu as pltpu


def _round_up(x, m):
    return ((x + m - 1) // m) * m


@functools.lru_cache(maxsize=None)
def _vmem_config():
    """(vmem_limit_bytes, working_set_budget) sized from the actual chip.

    v5e/v6e expose 128 MiB of physical VMEM (scoped default is only 16/32 MiB); v7x has
    64 MiB per TensorCore — so both numbers are derived from the reported capacity instead
    of hard-coding a conservative 32 MiB everywhere.
    """
    try:
        cap = int(getattr(pltpu.get_tpu_info(), "vmem_capacity_bytes", 64 * 1024 * 1024))
    except Exception:
        cap = 64 * 1024 * 1024                       # conservative fallback (v7x-sized)
    limit = min((cap * 3) // 4, 112 * 1024 * 1024)   # ~96 MiB on 128 MiB parts, ~48 MiB on v7x
    budget = (limit * 2) // 3                        # working-set budget for row-tile sizing
    return limit, budget


def _mosaic_params():
    limit, _ = _vmem_config()
    return pltpu.CompilerParams(
        dimension_semantics=("parallel",),           # independent grid steps; megacore on v7x
        vmem_limit_bytes=limit,
    )


def _check_resident(resident_bytes):
    _, budget = _vmem_config()
    if 2 * resident_bytes > budget:                  # x2: Pallas double-buffers the blocks
        # TODO(synk): K/N-tile the resident weights with an f32 accumulator scratch for large
        # d_model / ffn_hidden (needed first on v7x's 64 MiB VMEM); not required at these sizes.
        raise NotImplementedError(
            "weights too large to stay VMEM-resident; add a K/N grid axis (see TODO)")


def _pick_row_tile(rows, cap):
    """Largest multiple-of-8 row tile that divides `rows` exactly (no pad / slice copies),
    preferring a grid of >= 2 steps so both v7x TensorCores get work."""
    divisors = [t for t in range(8, min(rows, cap) + 1, 8) if rows % t == 0]
    if not divisors:
        return None
    multi = [t for t in divisors if rows // t >= 2]
    return max(multi) if multi else max(divisors)


def _row_tiling(rows, streamed_bytes_per_row, resident_bytes):
    _, budget = _vmem_config()
    avail = max(budget - 2 * resident_bytes, 16 * streamed_bytes_per_row)
    cap = avail // max(2 * streamed_bytes_per_row, 1)   # /2: double-buffered row tiles
    cap = max(8, min(int(cap), 4096) // 8 * 8)
    tile = _pick_row_tile(rows, cap)
    if tile is not None:
        return tile, rows                               # fast path: no padding needed
    # Fallback (rows not a multiple of 8): pad + slice — extra HBM copy, off the fast path.
    tile = max(8, min(cap, _round_up(rows, 8)) // 8 * 8)
    return tile, _round_up(rows, tile)


def _pad_rows(x2, padded):
    rows = x2.shape[0]
    if padded == rows:
        return x2
    return jnp.pad(x2, ((0, padded - rows), (0, 0)))


def _softmax_rows(s):
    """Row softmax with EUP reciprocal (no per-element divide on the VALU)."""
    s = s - jnp.max(s, axis=-1, keepdims=True)
    e = jnp.exp(s)
    return e * pl.reciprocal(jnp.sum(e, axis=-1, keepdims=True), approx=True)


# --------------------------------------------------------------------------
# Fused QKV projection + per-head (causal) attention — one batch per grid step
# --------------------------------------------------------------------------
def _self_attn_kernel(y_ref, w_ref, b_ref, o_ref, *, num_heads, head_dim, scale, causal):
    S = y_ref.shape[1]
    y = y_ref[0].astype(jnp.bfloat16)                                   # (S, D)
    w = w_ref[...].astype(jnp.bfloat16)                                 # (D, 3D) VMEM-resident
    qkv = jnp.dot(y, w, preferred_element_type=jnp.float32)             # MXU, f32 accumulate
    qkv = qkv + b_ref[...].astype(jnp.float32)                          # (S, 3D)

    if causal:                                                          # in-kernel look-ahead mask
        row = jax.lax.broadcasted_iota(jnp.int32, (S, S), 0)
        col = jax.lax.broadcasted_iota(jnp.int32, (S, S), 1)
        addmask = jnp.where(col <= row, 0.0, -1e9).astype(jnp.float32)

    for h in range(num_heads):                                          # static unroll over heads
        base = 3 * head_dim * h                                         # PyTorch qkv chunk layout
        q = qkv[:, base:base + head_dim].astype(jnp.bfloat16)
        k = qkv[:, base + head_dim:base + 2 * head_dim].astype(jnp.bfloat16)
        v = qkv[:, base + 2 * head_dim:base + 3 * head_dim].astype(jnp.bfloat16)
        # q @ k^T without materializing a transpose: contract the last dims directly.
        s = jax.lax.dot_general(q, k, (((1,), (1,)), ((), ())),
                                preferred_element_type=jnp.float32) * scale
        if causal:
            s = s + addmask
        p = _softmax_rows(s)
        vals = jnp.dot(p.astype(jnp.bfloat16), v, preferred_element_type=jnp.float32)
        # Rows [h*S, (h+1)*S): together with the caller's free contiguous reshape this
        # reproduces PyTorch's values.reshape(B, S, D) (NO transpose of the head axis).
        o_ref[0, h * S:(h + 1) * S, :] = vals.astype(o_ref.dtype)


def fused_self_attention(y, qkv_w, qkv_b, *, num_heads, causal=True):
    """Per-batch fused QKV projection + per-head attention.  Returns (B, H*S, Dh) f32."""
    # TODO(synk): full-S^2 scores per head; a flash-style KV grid axis is needed for long S
    # (earliest on v7x).  TODO(synk): only causal / no-mask supported in-kernel; arbitrary
    # additive decoder masks would need a streamed (S, S) mask operand.
    B, S, D = y.shape
    Dh = D // num_heads
    w_bf = qkv_w.astype(jnp.bfloat16)               # bf16 resident weight: half the DMA/VMEM
    b2 = qkv_b.reshape(1, 3 * D)
    _check_resident(w_bf.size * w_bf.dtype.itemsize + b2.size * 4)
    kernel = functools.partial(_self_attn_kernel, num_heads=num_heads, head_dim=Dh,
                               scale=1.0 / math.sqrt(Dh), causal=causal)
    return pl.pallas_call(
        kernel,
        out_shape=jax.ShapeDtypeStruct((B, num_heads * S, Dh), jnp.float32),
        grid_spec=pltpu.PrefetchScalarGridSpec(
            num_scalar_prefetch=0,
            grid=(B,),
            in_specs=[
                pl.BlockSpec((1, S, D), lambda b: (b, 0, 0)),
                pl.BlockSpec((D, 3 * D), lambda b: (0, 0)),     # VMEM-resident weight
                pl.BlockSpec((1, 3 * D), lambda b: (0, 0)),
            ],
            out_specs=pl.BlockSpec((1, num_heads * S, Dh), lambda b: (b, 0, 0)),
        ),
        compiler_params=_mosaic_params(),
    )(y, w_bf, b2)


# --------------------------------------------------------------------------
# Fused KV / Q projections + per-head attention (no mask) — one batch per grid step
# --------------------------------------------------------------------------
def _cross_attn_kernel(ykv_ref, xq_ref, kvw_ref, kvb_ref, qw_ref, qb_ref, o_ref,
                       *, num_heads, head_dim, scale):
    S = ykv_ref.shape[1]
    ykv = ykv_ref[0].astype(jnp.bfloat16)                               # decoder state -> K, V
    xq = xq_ref[0].astype(jnp.bfloat16)                                 # encoder output -> Q
    kv = jnp.dot(ykv, kvw_ref[...].astype(jnp.bfloat16),
                 preferred_element_type=jnp.float32) + kvb_ref[...].astype(jnp.float32)
    qa = jnp.dot(xq, qw_ref[...].astype(jnp.bfloat16),
                 preferred_element_type=jnp.float32) + qb_ref[...].astype(jnp.float32)
    for h in range(num_heads):
        kb = 2 * head_dim * h                                           # PyTorch kv chunk layout
        k = kv[:, kb:kb + head_dim].astype(jnp.bfloat16)
        v = kv[:, kb + head_dim:kb + 2 * head_dim].astype(jnp.bfloat16)
        q = qa[:, h * head_dim:(h + 1) * head_dim].astype(jnp.bfloat16)
        s = jax.lax.dot_general(q, k, (((1,), (1,)), ((), ())),
                                preferred_element_type=jnp.float32) * scale
        p = _softmax_rows(s)
        vals = jnp.dot(p.astype(jnp.bfloat16), v, preferred_element_type=jnp.float32)
        o_ref[0, h * S:(h + 1) * S, :] = vals.astype(o_ref.dtype)


def fused_cross_attention(y_kv, x_q, kv_w, kv_b, q_w, q_b, *, num_heads):
    B, S, D = y_kv.shape
    Dh = D // num_heads
    kvw_bf = kv_w.astype(jnp.bfloat16)
    qw_bf = q_w.astype(jnp.bfloat16)
    kvb2 = kv_b.reshape(1, 2 * D)
    qb2 = q_b.reshape(1, D)
    _check_resident(kvw_bf.size * 2 + qw_bf.size * 2 + (kvb2.size + qb2.size) * 4)
    kernel = functools.partial(_cross_attn_kernel, num_heads=num_heads, head_dim=Dh,
                               scale=1.0 / math.sqrt(Dh))
    return pl.pallas_call(
        kernel,
        out_shape=jax.ShapeDtypeStruct((B, num_heads * S, Dh), jnp.float32),
        grid_spec=pltpu.PrefetchScalarGridSpec(
            num_scalar_prefetch=0,
            grid=(B,),
            in_specs=[
                pl.BlockSpec((1, S, D), lambda b: (b, 0, 0)),
                pl.BlockSpec((1, S, D), lambda b: (b, 0, 0)),
                pl.BlockSpec((D, 2 * D), lambda b: (0, 0)),
                pl.BlockSpec((1, 2 * D), lambda b: (0, 0)),
                pl.BlockSpec((D, D), lambda b: (0, 0)),
                pl.BlockSpec((1, D), lambda b: (0, 0)),
            ],
            out_specs=pl.BlockSpec((1, num_heads * S, Dh), lambda b: (b, 0, 0)),
        ),
        compiler_params=_mosaic_params(),
    )(y_kv, x_q, kvw_bf, kvb2, qw_bf, qb2)


# --------------------------------------------------------------------------
# Fused output projection + residual add + LayerNorm (row-tiled)
# --------------------------------------------------------------------------
def _proj_add_ln_kernel(v_ref, res_ref, w_ref, b_ref, g_ref, beta_ref, o_ref, *, eps, inv_h):
    v = v_ref[...].astype(jnp.bfloat16)
    w = w_ref[...].astype(jnp.bfloat16)
    proj = jnp.dot(v, w, preferred_element_type=jnp.float32) + b_ref[...].astype(jnp.float32)
    x = proj + res_ref[...].astype(jnp.float32)                         # fused residual add
    mean = jnp.sum(x, axis=-1, keepdims=True) * inv_h
    cen = x - mean
    var = jnp.sum(cen * cen, axis=-1, keepdims=True) * inv_h
    yn = cen * jax.lax.rsqrt(var + eps)                                 # EUP rsqrt, no divide
    o_ref[...] = (g_ref[...].astype(jnp.float32) * yn
                  + beta_ref[...].astype(jnp.float32)).astype(o_ref.dtype)


def proj_add_layernorm(vals2d, residual2d, w, b, gamma, beta, *, eps=1e-5):
    """out = LayerNorm(vals2d @ w + b + residual2d) — projection, residual add, LN in one kernel."""
    rows, K = vals2d.shape
    N = w.shape[1]
    w_bf = w.astype(jnp.bfloat16)
    b2, g2, beta2 = b.reshape(1, N), gamma.reshape(1, N), beta.reshape(1, N)
    resident = w_bf.size * 2 + 3 * N * 4
    _check_resident(resident)
    streamed = K * vals2d.dtype.itemsize + 2 * N * 4                    # vals in, residual in, out
    tile, padded = _row_tiling(rows, streamed, resident)
    vp = _pad_rows(vals2d, padded)
    rp = _pad_rows(residual2d, padded)
    out = pl.pallas_call(
        functools.partial(_proj_add_ln_kernel, eps=eps, inv_h=1.0 / N),
        out_shape=jax.ShapeDtypeStruct((padded, N), residual2d.dtype),
        grid_spec=pltpu.PrefetchScalarGridSpec(
            num_scalar_prefetch=0,
            grid=(padded // tile,),
            in_specs=[
                pl.BlockSpec((tile, K), lambda i: (i, 0)),
                pl.BlockSpec((tile, N), lambda i: (i, 0)),
                pl.BlockSpec((K, N), lambda i: (0, 0)),
                pl.BlockSpec((1, N), lambda i: (0, 0)),
                pl.BlockSpec((1, N), lambda i: (0, 0)),
                pl.BlockSpec((1, N), lambda i: (0, 0)),
            ],
            out_specs=pl.BlockSpec((tile, N), lambda i: (i, 0)),
        ),
        compiler_params=_mosaic_params(),
    )(vp, rp, w_bf, b2, g2, beta2)
    return out if padded == rows else out[:rows]


# --------------------------------------------------------------------------
# Fused FFN (Linear -> ReLU -> Linear) + residual add + LayerNorm (row-tiled)
# --------------------------------------------------------------------------
def _ffn_add_ln_kernel(x_ref, w1_ref, b1_ref, w2_ref, b2_ref, g_ref, beta_ref, o_ref,
                       *, eps, inv_h):
    x32 = x_ref[...].astype(jnp.float32)
    h = jnp.dot(x_ref[...].astype(jnp.bfloat16), w1_ref[...].astype(jnp.bfloat16),
                preferred_element_type=jnp.float32)
    h = jnp.maximum(h + b1_ref[...].astype(jnp.float32), 0.0)           # ReLU
    f = jnp.dot(h.astype(jnp.bfloat16), w2_ref[...].astype(jnp.bfloat16),
                preferred_element_type=jnp.float32)
    x = f + b2_ref[...].astype(jnp.float32) + x32                       # fused residual add
    mean = jnp.sum(x, axis=-1, keepdims=True) * inv_h
    cen = x - mean
    var = jnp.sum(cen * cen, axis=-1, keepdims=True) * inv_h
    yn = cen * jax.lax.rsqrt(var + eps)
    o_ref[...] = (g_ref[...].astype(jnp.float32) * yn
                  + beta_ref[...].astype(jnp.float32)).astype(o_ref.dtype)


def ffn_add_layernorm(x2d, w1, b1, w2, b2, gamma, beta, *, eps=1e-5):
    """out = LayerNorm(relu(x @ w1 + b1) @ w2 + b2 + x) — the whole FFN block in one kernel."""
    rows, D = x2d.shape
    Hf = w1.shape[1]
    w1_bf, w2_bf = w1.astype(jnp.bfloat16), w2.astype(jnp.bfloat16)
    b1r, b2r = b1.reshape(1, Hf), b2.reshape(1, D)
    g2, beta2 = gamma.reshape(1, D), beta.reshape(1, D)
    resident = (w1_bf.size + w2_bf.size) * 2 + (Hf + 3 * D) * 4
    _check_resident(resident)
    streamed = 2 * D * 4 + Hf * 4                    # x tile in, out tile, hidden activation
    tile, padded = _row_tiling(rows, streamed, resident)
    xp = _pad_rows(x2d, padded)
    out = pl.pallas_call(
        functools.partial(_ffn_add_ln_kernel, eps=eps, inv_h=1.0 / D),
        out_shape=jax.ShapeDtypeStruct((padded, D), x2d.dtype),
        grid_spec=pltpu.PrefetchScalarGridSpec(
            num_scalar_prefetch=0,
            grid=(padded // tile,),
            in_specs=[
                pl.BlockSpec((tile, D), lambda i: (i, 0)),
                pl.BlockSpec((D, Hf), lambda i: (0, 0)),
                pl.BlockSpec((1, Hf), lambda i: (0, 0)),
                pl.BlockSpec((Hf, D), lambda i: (0, 0)),
                pl.BlockSpec((1, D), lambda i: (0, 0)),
                pl.BlockSpec((1, D), lambda i: (0, 0)),
                pl.BlockSpec((1, D), lambda i: (0, 0)),
            ],
            out_specs=pl.BlockSpec((tile, D), lambda i: (i, 0)),
        ),
        compiler_params=_mosaic_params(),
    )(xp, w1_bf, b1r, w2_bf, b2r, g2, beta2)
    return out if padded == rows else out[:rows]


# --------------------------------------------------------------------------
# DecoderLayer forward (matches the PyTorch module; dropout = identity / eval mode)
# --------------------------------------------------------------------------
def decoder_layer_forward(params, x, y, *, num_heads, eps=1e-5, causal=True):
    # TODO(synk): dropout1/2/3 are identity (eval-mode semantics); training dropout not implemented.
    B, S, D = y.shape
    rows = B * S

    # ---- masked self-attention + output projection + add & norm ----
    vals = fused_self_attention(y, params["qkv_w"], params["qkv_b"],
                                num_heads=num_heads, causal=causal)          # (B, H*S, Dh)
    # Free contiguous reshape: reproduces PyTorch's values.reshape(B, S, D)
    # (head-major, NO transpose of the head axis — exactly as in the reference module).
    vals = vals.reshape(rows, D)
    y1 = proj_add_layernorm(vals, y.reshape(rows, D), params["out1_w"], params["out1_b"],
                            params["g1"], params["b1"], eps=eps)             # (rows, D)

    # ---- encoder-decoder cross-attention (KV from decoder state, Q from encoder output,
    #      matching the PyTorch call encoder_decoder_attention(y, x)) ----
    vals = fused_cross_attention(y1.reshape(B, S, D), x,
                                 params["kv_w"], params["kv_b"],
                                 params["q_w"], params["q_b"], num_heads=num_heads)
    vals = vals.reshape(rows, D)
    y2 = proj_add_layernorm(vals, y1, params["out2_w"], params["out2_b"],
                            params["g2"], params["b2"], eps=eps)

    # ---- position-wise FFN + add & norm (residual is the FFN input itself) ----
    y3 = ffn_add_layernorm(y2, params["ffn_w1"], params["ffn_b1"],
                           params["ffn_w2"], params["ffn_b2"],
                           params["g3"], params["b3"], eps=eps)
    return y3.reshape(B, S, D)


# --------------------------------------------------------------------------
# Parameters & pure-JAX reference
# --------------------------------------------------------------------------
def init_decoder_params(key, d_model, ffn_hidden, num_heads):
    def lin(k, fan_in, fan_out):
        kw, kb = jax.random.split(k)
        bound = 1.0 / math.sqrt(fan_in)
        w = jax.random.uniform(kw, (fan_in, fan_out), jnp.float32, -bound, bound)
        b = jax.random.uniform(kb, (fan_out,), jnp.float32, -bound, bound)
        return w, b

    keys = jax.random.split(key, 7)
    params = {}
    params["qkv_w"], params["qkv_b"] = lin(keys[0], d_model, 3 * d_model)
    params["out1_w"], params["out1_b"] = lin(keys[1], d_model, d_model)
    params["kv_w"], params["kv_b"] = lin(keys[2], d_model, 2 * d_model)
    params["q_w"], params["q_b"] = lin(keys[3], d_model, d_model)
    params["out2_w"], params["out2_b"] = lin(keys[4], d_model, d_model)
    params["ffn_w1"], params["ffn_b1"] = lin(keys[5], d_model, ffn_hidden)
    params["ffn_w2"], params["ffn_b2"] = lin(keys[6], ffn_hidden, d_model)
    for i in (1, 2, 3):
        params[f"g{i}"] = jnp.ones((d_model,), jnp.float32)
        params[f"b{i}"] = jnp.zeros((d_model,), jnp.float32)
    return params


def decoder_layer_ref(params, x, y, decoder_mask, *, num_heads, eps=1e-5):
    B, S, D = y.shape
    H = num_heads
    Dh = D // H

    def ln(v, g, b):
        mean = jnp.mean(v, axis=-1, keepdims=True)
        var = jnp.mean((v - mean) ** 2, axis=-1, keepdims=True)
        return g * (v - mean) / jnp.sqrt(var + eps) + b

    def sdp(q, k, v, mask):
        d_k = q.shape[-1]
        s = jnp.einsum("bhqd,bhkd->bhqk", q, k) / math.sqrt(d_k)
        if mask is not None:
            s = s + mask
        p = jax.nn.softmax(s, axis=-1)
        return jnp.einsum("bhqk,bhkd->bhqd", p, v)

    # self attention
    qkv = y @ params["qkv_w"] + params["qkv_b"]
    qkv = qkv.reshape(B, S, H, 3 * Dh).transpose(0, 2, 1, 3)
    q, k, v = jnp.split(qkv, 3, axis=-1)
    vals = sdp(q, k, v, decoder_mask).reshape(B, S, D)
    sa = vals @ params["out1_w"] + params["out1_b"]
    y1 = ln(sa + y, params["g1"], params["b1"])

    # cross attention (KV from decoder state, Q from encoder output — as in the PyTorch call)
    kv = y1 @ params["kv_w"] + params["kv_b"]
    q2 = x @ params["q_w"] + params["q_b"]
    kv = kv.reshape(B, S, H, 2 * Dh).transpose(0, 2, 1, 3)
    k2, v2 = jnp.split(kv, 2, axis=-1)
    q2 = q2.reshape(B, S, H, Dh).transpose(0, 2, 1, 3)
    vals2 = sdp(q2, k2, v2, None).reshape(B, S, D)
    ca = vals2 @ params["out2_w"] + params["out2_b"]
    y2 = ln(ca + y1, params["g2"], params["b2"])

    # ffn
    h = jnp.maximum(y2 @ params["ffn_w1"] + params["ffn_b1"], 0.0)
    f = h @ params["ffn_w2"] + params["ffn_b2"]
    return ln(f + y2, params["g3"], params["b3"])


if __name__ == "__main__":
    batch, seq, d_model, num_heads, ffn_hidden = 2, 8, 32, 4, 64
    eps = 1e-5

    key = jax.random.PRNGKey(0)
    kx, ky, kp = jax.random.split(key, 3)
    x_enc = jax.random.normal(kx, (batch, seq, d_model), dtype=jnp.float32)
    y_dec = jax.random.normal(ky, (batch, seq, d_model), dtype=jnp.float32)
    params = init_decoder_params(kp, d_model, ffn_hidden, num_heads)

    fwd = jax.jit(functools.partial(decoder_layer_forward, num_heads=num_heads, eps=eps))
    out = jax.block_until_ready(fwd(params, x_enc, y_dec))

    # Pure-JAX reference using the explicit causal (look-ahead) decoder mask.
    causal = jnp.tril(jnp.ones((seq, seq), dtype=bool))
    decoder_mask = jnp.where(causal, 0.0, -1e9).astype(jnp.float32)
    ref = decoder_layer_ref(params, x_enc, y_dec, decoder_mask, num_heads=num_heads, eps=eps)

    assert out.shape == y_dec.shape and out.dtype == y_dec.dtype
    max_diff = float(jnp.max(jnp.abs(out - ref)))
    # Tolerance sized for bf16 MXU operands vs. the all-f32 reference.
    assert jnp.allclose(out, ref, atol=3e-2, rtol=3e-2), \
        f"mismatch vs reference (max abs diff {max_diff})"

    print("KERNEL_OK")
</pallas_src>

<mosaic_0001>
module attributes {stable_mosaic.version = 11 : i64} {
  func.func @_self_attn_kernel(%arg0: i32, %arg1: memref<1x8x32xf32, #tpu.memory_space<vmem>>, %arg2: memref<32x96xbf16, #tpu.memory_space<vmem>>, %arg3: memref<1x96xf32, #tpu.memory_space<vmem>>, %arg4: memref<1x32x8xf32, #tpu.memory_space<vmem>>) attributes {dimension_semantics = [#tpu.dimension_semantics<parallel>], iteration_bounds = array<i64: 2>, scalar_prefetch = 0 : i64, scratch_operands = 0 : i64, tpu.core_type = #tpu.core_type<tc>, window_params = [{transform_indices = @transform_0, window_bounds = array<i64: 1, 8, 32>}, {pipeline_mode = #tpu.pipeline_mode<synchronous>, transform_indices = @transform_1, window_bounds = array<i64: 32, 96>}, {pipeline_mode = #tpu.pipeline_mode<synchronous>, transform_indices = @transform_2, window_bounds = array<i64: 1, 96>}, {transform_indices = @transform_3, window_bounds = array<i64: 1, 32, 8>}]} {
    %c0 = arith.constant 0 : index
    %c0_0 = arith.constant 0 : index
    %c0_1 = arith.constant 0 : index
    %0 = vector.load %arg1[%c0, %c0_0, %c0_1] : memref<1x8x32xf32, #tpu.memory_space<vmem>>, vector<1x8x32xf32>
    %1 = vector.shape_cast %0 : vector<1x8x32xf32> to vector<8x32xf32>
    %2 = arith.truncf %1 : vector<8x32xf32> to vector<8x32xbf16>
    %c0_2 = arith.constant 0 : index
    %c0_3 = arith.constant 0 : index
    %3 = vector.load %arg2[%c0_2, %c0_3] : memref<32x96xbf16, #tpu.memory_space<vmem>>, vector<32x96xbf16>
    %cst = arith.constant dense<0.000000e+00> : vector<8x96xf32>
    %4 = tpu.matmul %2, %3, %cst {dimension_numbers = #tpu.dot_dimension_numbers<[1], [0], [0], [1], [0, 0, 1, 1], [], []>} : vector<8x32xbf16>, vector<32x96xbf16>, vector<8x96xf32> -> vector<8x96xf32>
    %c0_4 = arith.constant 0 : index
    %c0_5 = arith.constant 0 : index
    %5 = vector.load %arg3[%c0_4, %c0_5] : memref<1x96xf32, #tpu.memory_space<vmem>>, vector<1x96xf32>
    %6 = vector.broadcast %5 : vector<1x96xf32> to vector<8x96xf32>
    %7 = arith.addf %4, %6 : vector<8x96xf32>
    %8 = tpu.iota {dimensions = array<i32: 0>} : vector<8x8xi32>
    %9 = tpu.iota {dimensions = array<i32: 1>} : vector<8x8xi32>
    %10 = arith.cmpi sle, %9, %8 : vector<8x8xi32>
    %cst_6 = arith.constant 0.000000e+00 : f32
    %cst_7 = arith.constant -1.000000e+09 : f32
    %11 = vector.broadcast %cst_6 : f32 to vector<8x8xf32>
    %12 = vector.broadcast %cst_7 : f32 to vector<8x8xf32>
    %13 = arith.select %10, %11, %12 : vector<8x8xi1>, vector<8x8xf32>
    %14 = vector.extract_strided_slice %7 {offsets = [0, 0], sizes = [8, 8], strides = [1, 1]} : vector<8x96xf32> to vector<8x8xf32>
    %15 = arith.truncf %14 : vector<8x8xf32> to vector<8x8xbf16>
    %16 = vector.extract_strided_slice %7 {offsets = [0, 8], sizes = [8, 8], strides = [1, 1]} : vector<8x96xf32> to vector<8x8xf32>
    %17 = arith.truncf %16 : vector<8x8xf32> to vector<8x8xbf16>
    %18 = vector.extract_strided_slice %7 {offsets = [0, 16], sizes = [8, 8], strides = [1, 1]} : vector<8x96xf32> to vector<8x8xf32>
    %19 = arith.truncf %18 : vector<8x8xf32> to vector<8x8xbf16>
    %cst_8 = arith.constant dense<0.000000e+00> : vector<8x8xf32>
    %20 = tpu.matmul %15, %17, %cst_8 {dimension_numbers = #tpu.dot_dimension_numbers<[1], [1], [0], [0], [0, 0, 1, 0], [], []>} : vector<8x8xbf16>, vector<8x8xbf16>, vector<8x8xf32> -> vector<8x8xf32>
    %cst_9 = arith.constant 0.353553385 : f32
    %21 = vector.broadcast %cst_9 : f32 to vector<8x8xf32>
    %22 = arith.mulf %20, %21 : vector<8x8xf32>
    %23 = arith.addf %22, %13 : vector<8x8xf32>
    %cst_10 = arith.constant dense<0xFF800000> : vector<8xf32>
    %24 = vector.multi_reduction <maximumf>, %23, %cst_10 [1] : vector<8x8xf32> to vector<8xf32>
    %25 = vector.shape_cast %24 : vector<8xf32> to vector<8x1xf32>
    %26 = vector.broadcast %25 : vector<8x1xf32> to vector<8x8xf32>
    %27 = arith.subf %23, %26 : vector<8x8xf32>
    %28 = math.exp %27 : vector<8x8xf32>
    %cst_11 = arith.constant dense<0.000000e+00> : vector<8xf32>
    %29 = vector.multi_reduction <add>, %28, %cst_11 [1] : vector<8x8xf32> to vector<8xf32>
    %30 = vector.shape_cast %29 : vector<8xf32> to vector<8x1xf32>
    %31 = tpu.reciprocal %30 {approx = true} : vector<8x1xf32> -> vector<8x1xf32>
    %32 = vector.broadcast %31 : vector<8x1xf32> to vector<8x8xf32>
    %33 = arith.mulf %28, %32 : vector<8x8xf32>
    %34 = arith.truncf %33 : vector<8x8xf32> to vector<8x8xbf16>
    %cst_12 = arith.constant dense<0.000000e+00> : vector<8x8xf32>
    %35 = tpu.matmul %34, %19, %cst_12 {dimension_numbers = #tpu.dot_dimension_numbers<[1], [0], [0], [1], [0, 0, 1, 1], [], []>} : vector<8x8xbf16>, vector<8x8xbf16>, vector<8x8xf32> -> vector<8x8xf32>
    %c0_13 = arith.constant 0 : index
    %c0_14 = arith.constant 0 : index
    %c0_15 = arith.constant 0 : index
    %36 = vector.load %arg4[%c0_13, %c0_14, %c0_15] : memref<1x32x8xf32, #tpu.memory_space<vmem>>, vector<1x8x8xf32>
    %37 = vector.shape_cast %36 : vector<1x8x8xf32> to vector<8x8xf32>
    %38 = vector.shape_cast %35 : vector<8x8xf32> to vector<1x8x8xf32>
    tpu.vector_store %arg4[%c0_13, %c0_14, %c0_15], %38 {strides = array<i32>} : memref<1x32x8xf32, #tpu.memory_space<vmem>>, vector<1x8x8xf32>,
    %39 = vector.extract_strided_slice %7 {offsets = [0, 24], sizes = [8, 8], strides = [1, 1]} : vector<8x96xf32> to vector<8x8xf32>
    %40 = arith.truncf %39 : vector<8x8xf32> to vector<8x8xbf16>
    %41 = vector.extract_strided_slice %7 {offsets = [0, 32], sizes = [8, 8], strides = [1, 1]} : vector<8x96xf32> to vector<8x8xf32>
    %42 = arith.truncf %41 : vector<8x8xf32> to vector<8x8xbf16>
    %43 = vector.extract_strided_slice %7 {offsets = [0, 40], sizes = [8, 8], strides = [1, 1]} : vector<8x96xf32> to vector<8x8xf32>
    %44 = arith.truncf %43 : vector<8x8xf32> to vector<8x8xbf16>
    %cst_16 = arith.constant dense<0.000000e+00> : vector<8x8xf32>
    %45 = tpu.matmul %40, %42, %cst_16 {dimension_numbers = #tpu.dot_dimension_numbers<[1], [1], [0], [0], [0, 0, 1, 0], [], []>} : vector<8x8xbf16>, vector<8x8xbf16>, vector<8x8xf32> -> vector<8x8xf32>
    %cst_17 = arith.constant 0.353553385 : f32
    %46 = vector.broadcast %cst_17 : f32 to vector<8x8xf32>
    %47 = arith.mulf %45, %46 : vector<8x8xf32>
    %48 = arith.addf %47, %13 : vector<8x8xf32>
    %cst_18 = arith.constant dense<0xFF800000> : vector<8xf32>
    %49 = vector.multi_reduction <maximumf>, %48, %cst_18 [1] : vector<8x8xf32> to vector<8xf32>
    %50 = vector.shape_cast %49 : vector<8xf32> to vector<8x1xf32>
    %51 = vector.broadcast %50 : vector<8x1xf32> to vector<8x8xf32>
    %52 = arith.subf %48, %51 : vector<8x8xf32>
    %53 = math.exp %52 : vector<8x8xf32>
    %cst_19 = arith.constant dense<0.000000e+00> : vector<8xf32>
    %54 = vector.multi_reduction <add>, %53, %cst_19 [1] : vector<8x8xf32> to vector<8xf32>
    %55 = vector.shape_cast %54 : vector<8xf32> to vector<8x1xf32>
    %56 = tpu.reciprocal %55 {approx = true} : vector<8x1xf32> -> vector<8x1xf32>
    %57 = vector.broadcast %56 : vector<8x1xf32> to vector<8x8xf32>
    %58 = arith.mulf %53, %57 : vector<8x8xf32>
    %59 = arith.truncf %58 : vector<8x8xf32> to vector<8x8xbf16>
    %cst_20 = arith.constant dense<0.000000e+00> : vector<8x8xf32>
    %60 = tpu.matmul %59, %44, %cst_20 {dimension_numbers = #tpu.dot_dimension_numbers<[1], [0], [0], [1], [0, 0, 1, 1], [], []>} : vector<8x8xbf16>, vector<8x8xbf16>, vector<8x8xf32> -> vector<8x8xf32>
    %c0_21 = arith.constant 0 : index
    %c8 = arith.constant 8 : index
    %c0_22 = arith.constant 0 : index
    %61 = vector.load %arg4[%c0_21, %c8, %c0_22] : memref<1x32x8xf32, #tpu.memory_space<vmem>>, vector<1x8x8xf32>
    %62 = vector.shape_cast %61 : vector<1x8x8xf32> to vector<8x8xf32>
    %63 = vector.shape_cast %60 : vector<8x8xf32> to vector<1x8x8xf32>
    tpu.vector_store %arg4[%c0_21, %c8, %c0_22], %63 {strides = array<i32>} : memref<1x32x8xf32, #tpu.memory_space<vmem>>, vector<1x8x8xf32>,
    %64 = vector.extract_strided_slice %7 {offsets = [0, 48], sizes = [8, 8], strides = [1, 1]} : vector<8x96xf32> to vector<8x8xf32>
    %65 = arith.truncf %64 : vector<8x8xf32> to vector<8x8xbf16>
    %66 = vector.extract_strided_slice %7 {offsets = [0, 56], sizes = [8, 8], strides = [1, 1]} : vector<8x96xf32> to vector<8x8xf32>
    %67 = arith.truncf %66 : vector<8x8xf32> to vector<8x8xbf16>
    %68 = vector.extract_strided_slice %7 {offsets = [0, 64], sizes = [8, 8], strides = [1, 1]} : vector<8x96xf32> to vector<8x8xf32>
    %69 = arith.truncf %68 : vector<8x8xf32> to vector<8x8xbf16>
    %cst_23 = arith.constant dense<0.000000e+00> : vector<8x8xf32>
    %70 = tpu.matmul %65, %67, %cst_23 {dimension_numbers = #tpu.dot_dimension_numbers<[1], [1], [0], [0], [0, 0, 1, 0], [], []>} : vector<8x8xbf16>, vector<8x8xbf16>, vector<8x8xf32> -> vector<8x8xf32>
    %cst_24 = arith.constant 0.353553385 : f32
    %71 = vector.broadcast %cst_24 : f32 to vector<8x8xf32>
    %72 = arith.mulf %70, %71 : vector<8x8xf32>
    %73 = arith.addf %72, %13 : vector<8x8xf32>
    %cst_25 = arith.constant dense<0xFF800000> : vector<8xf32>
    %74 = vector.multi_reduction <maximumf>, %73, %cst_25 [1] : vector<8x8xf32> to vector<8xf32>
    %75 = vector.shape_cast %74 : vector<8xf32> to vector<8x1xf32>
    %76 = vector.broadcast %75 : vector<8x1xf32> to vector<8x8xf32>
    %77 = arith.subf %73, %76 : vector<8x8xf32>
    %78 = math.exp %77 : vector<8x8xf32>
    %cst_26 = arith.constant dense<0.000000e+00> : vector<8xf32>
    %79 = vector.multi_reduction <add>, %78, %cst_26 [1] : vector<8x8xf32> to vector<8xf32>
    %80 = vector.shape_cast %79 : vector<8xf32> to vector<8x1xf32>
    %81 = tpu.reciprocal %80 {approx = true} : vector<8x1xf32> -> vector<8x1xf32>
    %82 = vector.broadcast %81 : vector<8x1xf32> to vector<8x8xf32>
    %83 = arith.mulf %78, %82 : vector<8x8xf32>
    %84 = arith.truncf %83 : vector<8x8xf32> to vector<8x8xbf16>
    %cst_27 = arith.constant dense<0.000000e+00> : vector<8x8xf32>
    %85 = tpu.matmul %84, %69, %cst_27 {dimension_numbers = #tpu.dot_dimension_numbers<[1], [0], [0], [1], [0, 0, 1, 1], [], []>} : vector<8x8xbf16>, vector<8x8xbf16>, vector<8x8xf32> -> vector<8x8xf32>
    %c0_28 = arith.constant 0 : index
    %c16 = arith.constant 16 : index
    %c0_29 = arith.constant 0 : index
    %86 = vector.load %arg4[%c0_28, %c16, %c0_29] : memref<1x32x8xf32, #tpu.memory_space<vmem>>, vector<1x8x8xf32>
    %87 = vector.shape_cast %86 : vector<1x8x8xf32> to vector<8x8xf32>
    %88 = vector.shape_cast %85 : vector<8x8xf32> to vector<1x8x8xf32>
    tpu.vector_store %arg4[%c0_28, %c16, %c0_29], %88 {strides = array<i32>} : memref<1x32x8xf32, #tpu.memory_space<vmem>>, vector<1x8x8xf32>,
    %89 = vector.extract_strided_slice %7 {offsets = [0, 72], sizes = [8, 8], strides = [1, 1]} : vector<8x96xf32> to vector<8x8xf32>
    %90 = arith.truncf %89 : vector<8x8xf32> to vector<8x8xbf16>
    %91 = vector.extract_strided_slice %7 {offsets = [0, 80], sizes = [8, 8], strides = [1, 1]} : vector<8x96xf32> to vector<8x8xf32>
    %92 = arith.truncf %91 : vector<8x8xf32> to vector<8x8xbf16>
    %93 = vector.extract_strided_slice %7 {offsets = [0, 88], sizes = [8, 8], strides = [1, 1]} : vector<8x96xf32> to vector<8x8xf32>
    %94 = arith.truncf %93 : vector<8x8xf32> to vector<8x8xbf16>
    %cst_30 = arith.constant dense<0.000000e+00> : vector<8x8xf32>
    %95 = tpu.matmul %90, %92, %cst_30 {dimension_numbers = #tpu.dot_dimension_numbers<[1], [1], [0], [0], [0, 0, 1, 0], [], []>} : vector<8x8xbf16>, vector<8x8xbf16>, vector<8x8xf32> -> vector<8x8xf32>
    %cst_31 = arith.constant 0.353553385 : f32
    %96 = vector.broadcast %cst_31 : f32 to vector<8x8xf32>
    %97 = arith.mulf %95, %96 : vector<8x8xf32>
    %98 = arith.addf %97, %13 : vector<8x8xf32>
    %cst_32 = arith.constant dense<0xFF800000> : vector<8xf32>
    %99 = vector.multi_reduction <maximumf>, %98, %cst_32 [1] : vector<8x8xf32> to vector<8xf32>
    %100 = vector.shape_cast %99 : vector<8xf32> to vector<8x1xf32>
    %101 = vector.broadcast %100 : vector<8x1xf32> to vector<8x8xf32>
    %102 = arith.subf %98, %101 : vector<8x8xf32>
    %103 = math.exp %102 : vector<8x8xf32>
    %cst_33 = arith.constant dense<0.000000e+00> : vector<8xf32>
    %104 = vector.multi_reduction <add>, %103, %cst_33 [1] : vector<8x8xf32> to vector<8xf32>
    %105 = vector.shape_cast %104 : vector<8xf32> to vector<8x1xf32>
    %106 = tpu.reciprocal %105 {approx = true} : vector<8x1xf32> -> vector<8x1xf32>
    %107 = vector.broadcast %106 : vector<8x1xf32> to vector<8x8xf32>
    %108 = arith.mulf %103, %107 : vector<8x8xf32>
    %109 = arith.truncf %108 : vector<8x8xf32> to vector<8x8xbf16>
    %cst_34 = arith.constant dense<0.000000e+00> : vector<8x8xf32>
    %110 = tpu.matmul %109, %94, %cst_34 {dimension_numbers = #tpu.dot_dimension_numbers<[1], [0], [0], [1], [0, 0, 1, 1], [], []>} : vector<8x8xbf16>, vector<8x8xbf16>, vector<8x8xf32> -> vector<8x8xf32>
    %c0_35 = arith.constant 0 : index
    %c24 = arith.constant 24 : index
    %c0_36 = arith.constant 0 : index
    %111 = vector.load %arg4[%c0_35, %c24, %c0_36] : memref<1x32x8xf32, #tpu.memory_space<vmem>>, vector<1x8x8xf32>
    %112 = vector.shape_cast %111 : vector<1x8x8xf32> to vector<8x8xf32>
    %113 = vector.shape_cast %110 : vector<8x8xf32> to vector<1x8x8xf32>
    tpu.vector_store %arg4[%c0_35, %c24, %c0_36], %113 {strides = array<i32>} : memref<1x32x8xf32, #tpu.memory_space<vmem>>, vector<1x8x8xf32>,
    return
  }
  func.func @transform_0(%arg0: i32) -> (i32, i32, i32) {
    %c0_i32 = arith.constant 0 : i32
    %c0_i32_0 = arith.constant 0 : i32
    %c0_i32_1 = arith.constant 0 : i32
    return %arg0, %c0_i32, %c0_i32_0 : i32, i32, i32
  }
  func.func @transform_1(%arg0: i32) -> (i32, i32) {
    %c0_i32 = arith.constant 0 : i32
    %c0_i32_0 = arith.constant 0 : i32
    %c0_i32_1 = arith.constant 0 : i32
    return %c0_i32, %c0_i32_0 : i32, i32
  }
  func.func @transform_2(%arg0: i32) -> (i32, i32) {
    %c0_i32 = arith.constant 0 : i32
    %c0_i32_0 = arith.constant 0 : i32
    %c0_i32_1 = arith.constant 0 : i32
    return %c0_i32, %c0_i32_0 : i32, i32
  }
  func.func @transform_3(%arg0: i32) -> (i32, i32, i32) {
    %c0_i32 = arith.constant 0 : i32
    %c0_i32_0 = arith.constant 0 : i32
    %c0_i32_1 = arith.constant 0 : i32
    return %arg0, %c0_i32, %c0_i32_0 : i32, i32, i32
  }
}

module attributes {stable_mosaic.version = 11 : i64} {
  func.func @_proj_add_ln_kernel(%arg0: i32, %arg1: memref<8x32xf32, #tpu.memory_space<vmem>>, %arg2: memref<8x32xf32, #tpu.memory_space<vmem>>, %arg3: memref<32x32xbf16, #tpu.memory_space<vmem>>, %arg4: memref<1x32xf32, #tpu.memory_space<vmem>>, %arg5: memref<1x32xf32, #tpu.memory_space<vmem>>, %arg6: memref<1x32xf32, #tpu.memory_space<vmem>>, %arg7: memref<8x32xf32, #tpu.memory_space<vmem>>) attributes {dimension_semantics = [#tpu.dimension_semantics<parallel>], iteration_bounds = array<i64: 2>, scalar_prefetch = 0 : i64, scratch_operands = 0 : i64, tpu.core_type = #tpu.core_type<tc>, window_params = [{transform_indices = @transform_0, window_bounds = array<i64: 8, 32>}, {transform_indices = @transform_1, window_bounds = array<i64: 8, 32>}, {pipeline_mode = #tpu.pipeline_mode<synchronous>, transform_indices = @transform_2, window_bounds = array<i64: 32, 32>}, {pipeline_mode = #tpu.pipeline_mode<synchronous>, transform_indices = @transform_3, window_bounds = array<i64: 1, 32>}, {pipeline_mode = #tpu.pipeline_mode<synchronous>, transform_indices = @transform_4, window_bounds = array<i64: 1, 32>}, {pipeline_mode = #tpu.pipeline_mode<synchronous>, transform_indices = @transform_5, window_bounds = array<i64: 1, 32>}, {transform_indices = @transform_6, window_bounds = array<i64: 8, 32>}]} {
    %c0 = arith.constant 0 : index
    %c0_0 = arith.constant 0 : index
    %0 = vector.load %arg1[%c0, %c0_0] : memref<8x32xf32, #tpu.memory_space<vmem>>, vector<8x32xf32>
    %1 = arith.truncf %0 : vector<8x32xf32> to vector<8x32xbf16>
    %c0_1 = arith.constant 0 : index
    %c0_2 = arith.constant 0 : index
    %2 = vector.load %arg3[%c0_1, %c0_2] : memref<32x32xbf16, #tpu.memory_space<vmem>>, vector<32x32xbf16>
    %cst = arith.constant dense<0.000000e+00> : vector<8x32xf32>
    %3 = tpu.matmul %1, %2, %cst {dimension_numbers = #tpu.dot_dimension_numbers<[1], [0], [0], [1], [0, 0, 1, 1], [], []>} : vector<8x32xbf16>, vector<32x32xbf16>, vector<8x32xf32> -> vector<8x32xf32>
    %c0_3 = arith.constant 0 : index
    %c0_4 = arith.constant 0 : index
    %4 = vector.load %arg4[%c0_3, %c0_4] : memref<1x32xf32, #tpu.memory_space<vmem>>, vector<1x32xf32>
    %5 = vector.broadcast %4 : vector<1x32xf32> to vector<8x32xf32>
    %6 = arith.addf %3, %5 : vector<8x32xf32>
    %c0_5 = arith.constant 0 : index
    %c0_6 = arith.constant 0 : index
    %7 = vector.load %arg2[%c0_5, %c0_6] : memref<8x32xf32, #tpu.memory_space<vmem>>, vector<8x32xf32>
    %8 = arith.addf %6, %7 : vector<8x32xf32>
    %cst_7 = arith.constant dense<0.000000e+00> : vector<8xf32>
    %9 = vector.multi_reduction <add>, %8, %cst_7 [1] : vector<8x32xf32> to vector<8xf32>
    %10 = vector.shape_cast %9 : vector<8xf32> to vector<8x1xf32>
    %cst_8 = arith.constant 3.125000e-02 : f32
    %11 = vector.broadcast %cst_8 : f32 to vector<8x1xf32>
    %12 = arith.mulf %10, %11 : vector<8x1xf32>
    %13 = vector.broadcast %12 : vector<8x1xf32> to vector<8x32xf32>
    %14 = arith.subf %8, %13 : vector<8x32xf32>
    %15 = arith.mulf %14, %14 : vector<8x32xf32>
    %cst_9 = arith.constant dense<0.000000e+00> : vector<8xf32>
    %16 = vector.multi_reduction <add>, %15, %cst_9 [1] : vector<8x32xf32> to vector<8xf32>
    %17 = vector.shape_cast %16 : vector<8xf32> to vector<8x1xf32>
    %cst_10 = arith.constant 3.125000e-02 : f32
    %18 = vector.broadcast %cst_10 : f32 to vector<8x1xf32>
    %19 = arith.mulf %17, %18 : vector<8x1xf32>
    %cst_11 = arith.constant 9.99999974E-6 : f32
    %20 = vector.broadcast %cst_11 : f32 to vector<8x1xf32>
    %21 = arith.addf %19, %20 : vector<8x1xf32>
    %22 = math.rsqrt %21 : vector<8x1xf32>
    %23 = vector.broadcast %22 : vector<8x1xf32> to vector<8x32xf32>
    %24 = arith.mulf %14, %23 : vector<8x32xf32>
    %c0_12 = arith.constant 0 : index
    %c0_13 = arith.constant 0 : index
    %25 = vector.load %arg5[%c0_12, %c0_13] : memref<1x32xf32, #tpu.memory_space<vmem>>, vector<1x32xf32>
    %26 = vector.broadcast %25 : vector<1x32xf32> to vector<8x32xf32>
    %27 = arith.mulf %26, %24 : vector<8x32xf32>
    %c0_14 = arith.constant 0 : index
    %c0_15 = arith.constant 0 : index
    %28 = vector.load %arg6[%c0_14, %c0_15] : memref<1x32xf32, #tpu.memory_space<vmem>>, vector<1x32xf32>
    %29 = vector.broadcast %28 : vector<1x32xf32> to vector<8x32xf32>
    %30 = arith.addf %27, %29 : vector<8x32xf32>
    %c0_16 = arith.constant 0 : index
    %c0_17 = arith.constant 0 : index
    %31 = vector.load %arg7[%c0_16, %c0_17] : memref<8x32xf32, #tpu.memory_space<vmem>>, vector<8x32xf32>
    tpu.vector_store %arg7[%c0_16, %c0_17], %30 {strides = array<i32>} : memref<8x32xf32, #tpu.memory_space<vmem>>, vector<8x32xf32>,
    return
  }
  func.func @transform_0(%arg0: i32) -> (i32, i32) {
    %c0_i32 = arith.constant 0 : i32
    %c0_i32_0 = arith.constant 0 : i32
    return %arg0, %c0_i32 : i32, i32
  }
  func.func @transform_1(%arg0: i32) -> (i32, i32) {
    %c0_i32 = arith.constant 0 : i32
    %c0_i32_0 = arith.constant 0 : i32
    return %arg0, %c0_i32 : i32, i32
  }
  func.func @transform_2(%arg0: i32) -> (i32, i32) {
    %c0_i32 = arith.constant 0 : i32
    %c0_i32_0 = arith.constant 0 : i32
    %c0_i32_1 = arith.constant 0 : i32
    return %c0_i32, %c0_i32_0 : i32, i32
  }
  func.func @transform_3(%arg0: i32) -> (i32, i32) {
    %c0_i32 = arith.constant 0 : i32
    %c0_i32_0 = arith.constant 0 : i32
    %c0_i32_1 = arith.constant 0 : i32
    return %c0_i32, %c0_i32_0 : i32, i32
  }
  func.func @transform_4(%arg0: i32) -> (i32, i32) {
    %c0_i32 = arith.constant 0 : i32
    %c0_i32_0 = arith.constant 0 : i32
    %c0_i32_1 = arith.constant 0 : i32
    return %c0_i32, %c0_i32_0 : i32, i32
  }
  func.func @transform_5(%arg0: i32) -> (i32, i32) {
    %c0_i32 = arith.constant 0 : i32
    %c0_i32_0 = arith.constant 0 : i32
    %c0_i32_1 = arith.constant 0 : i32
    return %c0_i32, %c0_i32_0 : i32, i32
  }
  func.func @transform_6(%arg0: i32) -> (i32, i32) {
    %c0_i32 = arith.constant 0 : i32
    %c0_i32_0 = arith.constant 0 : i32
    return %arg0, %c0_i32 : i32, i32
  }
}

module attributes {stable_mosaic.version = 11 : i64} {
  func.func @_cross_attn_kernel(%arg0: i32, %arg1: memref<1x8x32xf32, #tpu.memory_space<vmem>>, %arg2: memref<1x8x32xf32, #tpu.memory_space<vmem>>, %arg3: memref<32x64xbf16, #tpu.memory_space<vmem>>, %arg4: memref<1x64xf32, #tpu.memory_space<vmem>>, %arg5: memref<32x32xbf16, #tpu.memory_space<vmem>>, %arg6: memref<1x32xf32, #tpu.memory_space<vmem>>, %arg7: memref<1x32x8xf32, #tpu.memory_space<vmem>>) attributes {dimension_semantics = [#tpu.dimension_semantics<parallel>], iteration_bounds = array<i64: 2>, scalar_prefetch = 0 : i64, scratch_operands = 0 : i64, tpu.core_type = #tpu.core_type<tc>, window_params = [{transform_indices = @transform_0, window_bounds = array<i64: 1, 8, 32>}, {transform_indices = @transform_1, window_bounds = array<i64: 1, 8, 32>}, {pipeline_mode = #tpu.pipeline_mode<synchronous>, transform_indices = @transform_2, window_bounds = array<i64: 32, 64>}, {pipeline_mode = #tpu.pipeline_mode<synchronous>, transform_indices = @transform_3, window_bounds = array<i64: 1, 64>}, {pipeline_mode = #tpu.pipeline_mode<synchronous>, transform_indices = @transform_4, window_bounds = array<i64: 32, 32>}, {pipeline_mode = #tpu.pipeline_mode<synchronous>, transform_indices = @transform_5, window_bounds = array<i64: 1, 32>}, {transform_indices = @transform_6, window_bounds = array<i64: 1, 32, 8>}]} {
    %c0 = arith.constant 0 : index
    %c0_0 = arith.constant 0 : index
    %c0_1 = arith.constant 0 : index
    %0 = vector.load %arg1[%c0, %c0_0, %c0_1] : memref<1x8x32xf32, #tpu.memory_space<vmem>>, vector<1x8x32xf32>
    %1 = vector.shape_cast %0 : vector<1x8x32xf32> to vector<8x32xf32>
    %2 = arith.truncf %1 : vector<8x32xf32> to vector<8x32xbf16>
    %c0_2 = arith.constant 0 : index
    %c0_3 = arith.constant 0 : index
    %c0_4 = arith.constant 0 : index
    %3 = vector.load %arg2[%c0_2, %c0_3, %c0_4] : memref<1x8x32xf32, #tpu.memory_space<vmem>>, vector<1x8x32xf32>
    %4 = vector.shape_cast %3 : vector<1x8x32xf32> to vector<8x32xf32>
    %5 = arith.truncf %4 : vector<8x32xf32> to vector<8x32xbf16>
    %c0_5 = arith.constant 0 : index
    %c0_6 = arith.constant 0 : index
    %6 = vector.load %arg3[%c0_5, %c0_6] : memref<32x64xbf16, #tpu.memory_space<vmem>>, vector<32x64xbf16>
    %cst = arith.constant dense<0.000000e+00> : vector<8x64xf32>
    %7 = tpu.matmul %2, %6, %cst {dimension_numbers = #tpu.dot_dimension_numbers<[1], [0], [0], [1], [0, 0, 1, 1], [], []>} : vector<8x32xbf16>, vector<32x64xbf16>, vector<8x64xf32> -> vector<8x64xf32>
    %c0_7 = arith.constant 0 : index
    %c0_8 = arith.constant 0 : index
    %8 = vector.load %arg4[%c0_7, %c0_8] : memref<1x64xf32, #tpu.memory_space<vmem>>, vector<1x64xf32>
    %9 = vector.broadcast %8 : vector<1x64xf32> to vector<8x64xf32>
    %10 = arith.addf %7, %9 : vector<8x64xf32>
    %c0_9 = arith.constant 0 : index
    %c0_10 = arith.constant 0 : index
    %11 = vector.load %arg5[%c0_9, %c0_10] : memref<32x32xbf16, #tpu.memory_space<vmem>>, vector<32x32xbf16>
    %cst_11 = arith.constant dense<0.000000e+00> : vector<8x32xf32>
    %12 = tpu.matmul %5, %11, %cst_11 {dimension_numbers = #tpu.dot_dimension_numbers<[1], [0], [0], [1], [0, 0, 1, 1], [], []>} : vector<8x32xbf16>, vector<32x32xbf16>, vector<8x32xf32> -> vector<8x32xf32>
    %c0_12 = arith.constant 0 : index
    %c0_13 = arith.constant 0 : index
    %13 = vector.load %arg6[%c0_12, %c0_13] : memref<1x32xf32, #tpu.memory_space<vmem>>, vector<1x32xf32>
    %14 = vector.broadcast %13 : vector<1x32xf32> to vector<8x32xf32>
    %15 = arith.addf %12, %14 : vector<8x32xf32>
    %16 = vector.extract_strided_slice %10 {offsets = [0, 0], sizes = [8, 8], strides = [1, 1]} : vector<8x64xf32> to vector<8x8xf32>
    %17 = arith.truncf %16 : vector<8x8xf32> to vector<8x8xbf16>
    %18 = vector.extract_strided_slice %10 {offsets = [0, 8], sizes = [8, 8], strides = [1, 1]} : vector<8x64xf32> to vector<8x8xf32>
    %19 = arith.truncf %18 : vector<8x8xf32> to vector<8x8xbf16>
    %20 = vector.extract_strided_slice %15 {offsets = [0, 0], sizes = [8, 8], strides = [1, 1]} : vector<8x32xf32> to vector<8x8xf32>
    %21 = arith.truncf %20 : vector<8x8xf32> to vector<8x8xbf16>
    %cst_14 = arith.constant dense<0.000000e+00> : vector<8x8xf32>
    %22 = tpu.matmul %21, %17, %cst_14 {dimension_numbers = #tpu.dot_dimension_numbers<[1], [1], [0], [0], [0, 0, 1, 0], [], []>} : vector<8x8xbf16>, vector<8x8xbf16>, vector<8x8xf32> -> vector<8x8xf32>
    %cst_15 = arith.constant 0.353553385 : f32
    %23 = vector.broadcast %cst_15 : f32 to vector<8x8xf32>
    %24 = arith.mulf %22, %23 : vector<8x8xf32>
    %cst_16 = arith.constant dense<0xFF800000> : vector<8xf32>
    %25 = vector.multi_reduction <maximumf>, %24, %cst_16 [1] : vector<8x8xf32> to vector<8xf32>
    %26 = vector.shape_cast %25 : vector<8xf32> to vector<8x1xf32>
    %27 = vector.broadcast %26 : vector<8x1xf32> to vector<8x8xf32>
    %28 = arith.subf %24, %27 : vector<8x8xf32>
    %29 = math.exp %28 : vector<8x8xf32>
    %cst_17 = arith.constant dense<0.000000e+00> : vector<8xf32>
    %30 = vector.multi_reduction <add>, %29, %cst_17 [1] : vector<8x8xf32> to vector<8xf32>
    %31 = vector.shape_cast %30 : vector<8xf32> to vector<8x1xf32>
    %32 = tpu.reciprocal %31 {approx = true} : vector<8x1xf32> -> vector<8x1xf32>
    %33 = vector.broadcast %32 : vector<8x1xf32> to vector<8x8xf32>
    %34 = arith.mulf %29, %33 : vector<8x8xf32>
    %35 = arith.truncf %34 : vector<8x8xf32> to vector<8x8xbf16>
    %cst_18 = arith.constant dense<0.000000e+00> : vector<8x8xf32>
    %36 = tpu.matmul %35, %19, %cst_18 {dimension_numbers = #tpu.dot_dimension_numbers<[1], [0], [0], [1], [0, 0, 1, 1], [], []>} : vector<8x8xbf16>, vector<8x8xbf16>, vector<8x8xf32> -> vector<8x8xf32>
    %c0_19 = arith.constant 0 : index
    %c0_20 = arith.constant 0 : index
    %c0_21 = arith.constant 0 : index
    %37 = vector.load %arg7[%c0_19, %c0_20, %c0_21] : memref<1x32x8xf32, #tpu.memory_space<vmem>>, vector<1x8x8xf32>
    %38 = vector.shape_cast %37 : vector<1x8x8xf32> to vector<8x8xf32>
    %39 = vector.shape_cast %36 : vector<8x8xf32> to vector<1x8x8xf32>
    tpu.vector_store %arg7[%c0_19, %c0_20, %c0_21], %39 {strides = array<i32>} : memref<1x32x8xf32, #tpu.memory_space<vmem>>, vector<1x8x8xf32>,
    %40 = vector.extract_strided_slice %10 {offsets = [0, 16], sizes = [8, 8], strides = [1, 1]} : vector<8x64xf32> to vector<8x8xf32>
    %41 = arith.truncf %40 : vector<8x8xf32> to vector<8x8xbf16>
    %42 = vector.extract_strided_slice %10 {offsets = [0, 24], sizes = [8, 8], strides = [1, 1]} : vector<8x64xf32> to vector<8x8xf32>
    %43 = arith.truncf %42 : vector<8x8xf32> to vector<8x8xbf16>
    %44 = vector.extract_strided_slice %15 {offsets = [0, 8], sizes = [8, 8], strides = [1, 1]} : vector<8x32xf32> to vector<8x8xf32>
    %45 = arith.truncf %44 : vector<8x8xf32> to vector<8x8xbf16>
    %cst_22 = arith.constant dense<0.000000e+00> : vector<8x8xf32>
    %46 = tpu.matmul %45, %41, %cst_22 {dimension_numbers = #tpu.dot_dimension_numbers<[1], [1], [0], [0], [0, 0, 1, 0], [], []>} : vector<8x8xbf16>, vector<8x8xbf16>, vector<8x8xf32> -> vector<8x8xf32>
    %cst_23 = arith.constant 0.353553385 : f32
    %47 = vector.broadcast %cst_23 : f32 to vector<8x8xf32>
    %48 = arith.mulf %46, %47 : vector<8x8xf32>
    %cst_24 = arith.constant dense<0xFF800000> : vector<8xf32>
    %49 = vector.multi_reduction <maximumf>, %48, %cst_24 [1] : vector<8x8xf32> to vector<8xf32>
    %50 = vector.shape_cast %49 : vector<8xf32> to vector<8x1xf32>
    %51 = vector.broadcast %50 : vector<8x1xf32> to vector<8x8xf32>
    %52 = arith.subf %48, %51 : vector<8x8xf32>
    %53 = math.exp %52 : vector<8x8xf32>
    %cst_25 = arith.constant dense<0.000000e+00> : vector<8xf32>
    %54 = vector.multi_reduction <add>, %53, %cst_25 [1] : vector<8x8xf32> to vector<8xf32>
    %55 = vector.shape_cast %54 : vector<8xf32> to vector<8x1xf32>
    %56 = tpu.reciprocal %55 {approx = true} : vector<8x1xf32> -> vector<8x1xf32>
    %57 = vector.broadcast %56 : vector<8x1xf32> to vector<8x8xf32>
    %58 = arith.mulf %53, %57 : vector<8x8xf32>
    %59 = arith.truncf %58 : vector<8x8xf32> to vector<8x8xbf16>
    %cst_26 = arith.constant dense<0.000000e+00> : vector<8x8xf32>
    %60 = tpu.matmul %59, %43, %cst_26 {dimension_numbers = #tpu.dot_dimension_numbers<[1], [0], [0], [1], [0, 0, 1, 1], [], []>} : vector<8x8xbf16>, vector<8x8xbf16>, vector<8x8xf32> -> vector<8x8xf32>
    %c0_27 = arith.constant 0 : index
    %c8 = arith.constant 8 : index
    %c0_28 = arith.constant 0 : index
    %61 = vector.load %arg7[%c0_27, %c8, %c0_28] : memref<1x32x8xf32, #tpu.memory_space<vmem>>, vector<1x8x8xf32>
    %62 = vector.shape_cast %61 : vector<1x8x8xf32> to vector<8x8xf32>
    %63 = vector.shape_cast %60 : vector<8x8xf32> to vector<1x8x8xf32>
    tpu.vector_store %arg7[%c0_27, %c8, %c0_28], %63 {strides = array<i32>} : memref<1x32x8xf32, #tpu.memory_space<vmem>>, vector<1x8x8xf32>,
    %64 = vector.extract_strided_slice %10 {offsets = [0, 32], sizes = [8, 8], strides = [1, 1]} : vector<8x64xf32> to vector<8x8xf32>
    %65 = arith.truncf %64 : vector<8x8xf32> to vector<8x8xbf16>
    %66 = vector.extract_strided_slice %10 {offsets = [0, 40], sizes = [8, 8], strides = [1, 1]} : vector<8x64xf32> to vector<8x8xf32>
    %67 = arith.truncf %66 : vector<8x8xf32> to vector<8x8xbf16>
    %68 = vector.extract_strided_slice %15 {offsets = [0, 16], sizes = [8, 8], strides = [1, 1]} : vector<8x32xf32> to vector<8x8xf32>
    %69 = arith.truncf %68 : vector<8x8xf32> to vector<8x8xbf16>
    %cst_29 = arith.constant dense<0.000000e+00> : vector<8x8xf32>
    %70 = tpu.matmul %69, %65, %cst_29 {dimension_numbers = #tpu.dot_dimension_numbers<[1], [1], [0], [0], [0, 0, 1, 0], [], []>} : vector<8x8xbf16>, vector<8x8xbf16>, vector<8x8xf32> -> vector<8x8xf32>
    %cst_30 = arith.constant 0.353553385 : f32
    %71 = vector.broadcast %cst_30 : f32 to vector<8x8xf32>
    %72 = arith.mulf %70, %71 : vector<8x8xf32>
    %cst_31 = arith.constant dense<0xFF800000> : vector<8xf32>
    %73 = vector.multi_reduction <maximumf>, %72, %cst_31 [1] : vector<8x8xf32> to vector<8xf32>
    %74 = vector.shape_cast %73 : vector<8xf32> to vector<8x1xf32>
    %75 = vector.broadcast %74 : vector<8x1xf32> to vector<8x8xf32>
    %76 = arith.subf %72, %75 : vector<8x8xf32>
    %77 = math.exp %76 : vector<8x8xf32>
    %cst_32 = arith.constant dense<0.000000e+00> : vector<8xf32>
    %78 = vector.multi_reduction <add>, %77, %cst_32 [1] : vector<8x8xf32> to vector<8xf32>
    %79 = vector.shape_cast %78 : vector<8xf32> to vector<8x1xf32>
    %80 = tpu.reciprocal %79 {approx = true} : vector<8x1xf32> -> vector<8x1xf32>
    %81 = vector.broadcast %80 : vector<8x1xf32> to vector<8x8xf32>
    %82 = arith.mulf %77, %81 : vector<8x8xf32>
    %83 = arith.truncf %82 : vector<8x8xf32> to vector<8x8xbf16>
    %cst_33 = arith.constant dense<0.000000e+00> : vector<8x8xf32>
    %84 = tpu.matmul %83, %67, %cst_33 {dimension_numbers = #tpu.dot_dimension_numbers<[1], [0], [0], [1], [0, 0, 1, 1], [], []>} : vector<8x8xbf16>, vector<8x8xbf16>, vector<8x8xf32> -> vector<8x8xf32>
    %c0_34 = arith.constant 0 : index
    %c16 = arith.constant 16 : index
    %c0_35 = arith.constant 0 : index
    %85 = vector.load %arg7[%c0_34, %c16, %c0_35] : memref<1x32x8xf32, #tpu.memory_space<vmem>>, vector<1x8x8xf32>
    %86 = vector.shape_cast %85 : vector<1x8x8xf32> to vector<8x8xf32>
    %87 = vector.shape_cast %84 : vector<8x8xf32> to vector<1x8x8xf32>
    tpu.vector_store %arg7[%c0_34, %c16, %c0_35], %87 {strides = array<i32>} : memref<1x32x8xf32, #tpu.memory_space<vmem>>, vector<1x8x8xf32>,
    %88 = vector.extract_strided_slice %10 {offsets = [0, 48], sizes = [8, 8], strides = [1, 1]} : vector<8x64xf32> to vector<8x8xf32>
    %89 = arith.truncf %88 : vector<8x8xf32> to vector<8x8xbf16>
    %90 = vector.extract_strided_slice %10 {offsets = [0, 56], sizes = [8, 8], strides = [1, 1]} : vector<8x64xf32> to vector<8x8xf32>
    %91 = arith.truncf %90 : vector<8x8xf32> to vector<8x8xbf16>
    %92 = vector.extract_strided_slice %15 {offsets = [0, 24], sizes = [8, 8], strides = [1, 1]} : vector<8x32xf32> to vector<8x8xf32>
    %93 = arith.truncf %92 : vector<8x8xf32> to vector<8x8xbf16>
    %cst_36 = arith.constant dense<0.000000e+00> : vector<8x8xf32>
    %94 = tpu.matmul %93, %89, %cst_36 {dimension_numbers = #tpu.dot_dimension_numbers<[1], [1], [0], [0], [0, 0, 1, 0], [], []>} : vector<8x8xbf16>, vector<8x8xbf16>, vector<8x8xf32> -> vector<8x8xf32>
    %cst_37 = arith.constant 0.353553385 : f32
    %95 = vector.broadcast %cst_37 : f32 to vector<8x8xf32>
    %96 = arith.mulf %94, %95 : vector<8x8xf32>
    %cst_38 = arith.constant dense<0xFF800000> : vector<8xf32>
    %97 = vector.multi_reduction <maximumf>, %96, %cst_38 [1] : vector<8x8xf32> to vector<8xf32>
    %98 = vector.shape_cast %97 : vector<8xf32> to vector<8x1xf32>
    %99 = vector.broadcast %98 : vector<8x1xf32> to vector<8x8xf32>
    %100 = arith.subf %96, %99 : vector<8x8xf32>
    %101 = math.exp %100 : vector<8x8xf32>
    %cst_39 = arith.constant dense<0.000000e+00> : vector<8xf32>
    %102 = vector.multi_reduction <add>, %101, %cst_39 [1] : vector<8x8xf32> to vector<8xf32>
    %103 = vector.shape_cast %102 : vector<8xf32> to vector<8x1xf32>
    %104 = tpu.reciprocal %103 {approx = true} : vector<8x1xf32> -> vector<8x1xf32>
    %105 = vector.broadcast %104 : vector<8x1xf32> to vector<8x8xf32>
    %106 = arith.mulf %101, %105 : vector<8x8xf32>
    %107 = arith.truncf %106 : vector<8x8xf32> to vector<8x8xbf16>
    %cst_40 = arith.constant dense<0.000000e+00> : vector<8x8xf32>
    %108 = tpu.matmul %107, %91, %cst_40 {dimension_numbers = #tpu.dot_dimension_numbers<[1], [0], [0], [1], [0, 0, 1, 1], [], []>} : vector<8x8xbf16>, vector<8x8xbf16>, vector<8x8xf32> -> vector<8x8xf32>
    %c0_41 = arith.constant 0 : index
    %c24 = arith.constant 24 : index
    %c0_42 = arith.constant 0 : index
    %109 = vector.load %arg7[%c0_41, %c24, %c0_42] : memref<1x32x8xf32, #tpu.memory_space<vmem>>, vector<1x8x8xf32>
    %110 = vector.shape_cast %109 : vector<1x8x8xf32> to vector<8x8xf32>
    %111 = vector.shape_cast %108 : vector<8x8xf32> to vector<1x8x8xf32>
    tpu.vector_store %arg7[%c0_41, %c24, %c0_42], %111 {strides = array<i32>} : memref<1x32x8xf32, #tpu.memory_space<vmem>>, vector<1x8x8xf32>,
    return
  }
  func.func @transform_0(%arg0: i32) -> (i32, i32, i32) {
    %c0_i32 = arith.constant 0 : i32
    %c0_i32_0 = arith.constant 0 : i32
    %c0_i32_1 = arith.constant 0 : i32
    return %arg0, %c0_i32, %c0_i32_0 : i32, i32, i32
  }
  func.func @transform_1(%arg0: i32) -> (i32, i32, i32) {
    %c0_i32 = arith.constant 0 : i32
    %c0_i32_0 = arith.constant 0 : i32
    %c0_i32_1 = arith.constant 0 : i32
    return %arg0, %c0_i32, %c0_i32_0 : i32, i32, i32
  }
  func.func @transform_2(%arg0: i32) -> (i32, i32) {
    %c0_i32 = arith.constant 0 : i32
    %c0_i32_0 = arith.constant 0 : i32
    %c0_i32_1 = arith.constant 0 : i32
    return %c0_i32, %c0_i32_0 : i32, i32
  }
  func.func @transform_3(%arg0: i32) -> (i32, i32) {
    %c0_i32 = arith.constant 0 : i32
    %c0_i32_0 = arith.constant 0 : i32
    %c0_i32_1 = arith.constant 0 : i32
    return %c0_i32, %c0_i32_0 : i32, i32
  }
  func.func @transform_4(%arg0: i32) -> (i32, i32) {
    %c0_i32 = arith.constant 0 : i32
    %c0_i32_0 = arith.constant 0 : i32
    %c0_i32_1 = arith.constant 0 : i32
    return %c0_i32, %c0_i32_0 : i32, i32
  }
  func.func @transform_5(%arg0: i32) -> (i32, i32) {
    %c0_i32 = arith.constant 0 : i32
    %c0_i32_0 = arith.constant 0 : i32
    %c0_i32_1 = arith.constant 0 : i32
    return %c0_i32, %c0_i32_0 : i32, i32
  }
  func.func @transform_6(%arg0: i32) -> (i32, i32, i32) {
    %c0_i32 = arith.constant 0 : i32
    %c0_i32_0 = arith.constant 0 : i32
    %c0_i32_1 = arith.constant 0 : i32
    return %arg0, %c0_i32, %c0_i32_0 : i32, i32, i32
  }
}

module attributes {stable_mosaic.version = 11 : i64} {
  func.func @_ffn_add_ln_kernel(%arg0: i32, %arg1: memref<8x32xf32, #tpu.memory_space<vmem>>, %arg2: memref<32x64xbf16, #tpu.memory_space<vmem>>, %arg3: memref<1x64xf32, #tpu.memory_space<vmem>>, %arg4: memref<64x32xbf16, #tpu.memory_space<vmem>>, %arg5: memref<1x32xf32, #tpu.memory_space<vmem>>, %arg6: memref<1x32xf32, #tpu.memory_space<vmem>>, %arg7: memref<1x32xf32, #tpu.memory_space<vmem>>, %arg8: memref<8x32xf32, #tpu.memory_space<vmem>>) attributes {dimension_semantics = [#tpu.dimension_semantics<parallel>], iteration_bounds = array<i64: 2>, scalar_prefetch = 0 : i64, scratch_operands = 0 : i64, tpu.core_type = #tpu.core_type<tc>, window_params = [{transform_indices = @transform_0, window_bounds = array<i64: 8, 32>}, {pipeline_mode = #tpu.pipeline_mode<synchronous>, transform_indices = @transform_1, window_bounds = array<i64: 32, 64>}, {pipeline_mode = #tpu.pipeline_mode<synchronous>, transform_indices = @transform_2, window_bounds = array<i64: 1, 64>}, {pipeline_mode = #tpu.pipeline_mode<synchronous>, transform_indices = @transform_3, window_bounds = array<i64: 64, 32>}, {pipeline_mode = #tpu.pipeline_mode<synchronous>, transform_indices = @transform_4, window_bounds = array<i64: 1, 32>}, {pipeline_mode = #tpu.pipeline_mode<synchronous>, transform_indices = @transform_5, window_bounds = array<i64: 1, 32>}, {pipeline_mode = #tpu.pipeline_mode<synchronous>, transform_indices = @transform_6, window_bounds = array<i64: 1, 32>}, {transform_indices = @transform_7, window_bounds = array<i64: 8, 32>}]} {
    %c0 = arith.constant 0 : index
    %c0_0 = arith.constant 0 : index
    %0 = vector.load %arg1[%c0, %c0_0] : memref<8x32xf32, #tpu.memory_space<vmem>>, vector<8x32xf32>
    %c0_1 = arith.constant 0 : index
    %c0_2 = arith.constant 0 : index
    %1 = vector.load %arg1[%c0_1, %c0_2] : memref<8x32xf32, #tpu.memory_space<vmem>>, vector<8x32xf32>
    %2 = arith.truncf %1 : vector<8x32xf32> to vector<8x32xbf16>
    %c0_3 = arith.constant 0 : index
    %c0_4 = arith.constant 0 : index
    %3 = vector.load %arg2[%c0_3, %c0_4] : memref<32x64xbf16, #tpu.memory_space<vmem>>, vector<32x64xbf16>
    %cst = arith.constant dense<0.000000e+00> : vector<8x64xf32>
    %4 = tpu.matmul %2, %3, %cst {dimension_numbers = #tpu.dot_dimension_numbers<[1], [0], [0], [1], [0, 0, 1, 1], [], []>} : vector<8x32xbf16>, vector<32x64xbf16>, vector<8x64xf32> -> vector<8x64xf32>
    %c0_5 = arith.constant 0 : index
    %c0_6 = arith.constant 0 : index
    %5 = vector.load %arg3[%c0_5, %c0_6] : memref<1x64xf32, #tpu.memory_space<vmem>>, vector<1x64xf32>
    %6 = vector.broadcast %5 : vector<1x64xf32> to vector<8x64xf32>
    %7 = arith.addf %4, %6 : vector<8x64xf32>
    %cst_7 = arith.constant 0.000000e+00 : f32
    %8 = vector.broadcast %cst_7 : f32 to vector<8x64xf32>
    %9 = arith.maximumf %7, %8 : vector<8x64xf32>
    %10 = arith.truncf %9 : vector<8x64xf32> to vector<8x64xbf16>
    %c0_8 = arith.constant 0 : index
    %c0_9 = arith.constant 0 : index
    %11 = vector.load %arg4[%c0_8, %c0_9] : memref<64x32xbf16, #tpu.memory_space<vmem>>, vector<64x32xbf16>
    %cst_10 = arith.constant dense<0.000000e+00> : vector<8x32xf32>
    %12 = tpu.matmul %10, %11, %cst_10 {dimension_numbers = #tpu.dot_dimension_numbers<[1], [0], [0], [1], [0, 0, 1, 1], [], []>} : vector<8x64xbf16>, vector<64x32xbf16>, vector<8x32xf32> -> vector<8x32xf32>
    %c0_11 = arith.constant 0 : index
    %c0_12 = arith.constant 0 : index
    %13 = vector.load %arg5[%c0_11, %c0_12] : memref<1x32xf32, #tpu.memory_space<vmem>>, vector<1x32xf32>
    %14 = vector.broadcast %13 : vector<1x32xf32> to vector<8x32xf32>
    %15 = arith.addf %12, %14 : vector<8x32xf32>
    %16 = arith.addf %15, %0 : vector<8x32xf32>
    %cst_13 = arith.constant dense<0.000000e+00> : vector<8xf32>
    %17 = vector.multi_reduction <add>, %16, %cst_13 [1] : vector<8x32xf32> to vector<8xf32>
    %18 = vector.shape_cast %17 : vector<8xf32> to vector<8x1xf32>
    %cst_14 = arith.constant 3.125000e-02 : f32
    %19 = vector.broadcast %cst_14 : f32 to vector<8x1xf32>
    %20 = arith.mulf %18, %19 : vector<8x1xf32>
    %21 = vector.broadcast %20 : vector<8x1xf32> to vector<8x32xf32>
    %22 = arith.subf %16, %21 : vector<8x32xf32>
    %23 = arith.mulf %22, %22 : vector<8x32xf32>
    %cst_15 = arith.constant dense<0.000000e+00> : vector<8xf32>
    %24 = vector.multi_reduction <add>, %23, %cst_15 [1] : vector<8x32xf32> to vector<8xf32>
    %25 = vector.shape_cast %24 : vector<8xf32> to vector<8x1xf32>
    %cst_16 = arith.constant 3.125000e-02 : f32
    %26 = vector.broadcast %cst_16 : f32 to vector<8x1xf32>
    %27 = arith.mulf %25, %26 : vector<8x1xf32>
    %cst_17 = arith.constant 9.99999974E-6 : f32
    %28 = vector.broadcast %cst_17 : f32 to vector<8x1xf32>
    %29 = arith.addf %27, %28 : vector<8x1xf32>
    %30 = math.rsqrt %29 : vector<8x1xf32>
    %31 = vector.broadcast %30 : vector<8x1xf32> to vector<8x32xf32>
    %32 = arith.mulf %22, %31 : vector<8x32xf32>
    %c0_18 = arith.constant 0 : index
    %c0_19 = arith.constant 0 : index
    %33 = vector.load %arg6[%c0_18, %c0_19] : memref<1x32xf32, #tpu.memory_space<vmem>>, vector<1x32xf32>
    %34 = vector.broadcast %33 : vector<1x32xf32> to vector<8x32xf32>
    %35 = arith.mulf %34, %32 : vector<8x32xf32>
    %c0_20 = arith.constant 0 : index
    %c0_21 = arith.constant 0 : index
    %36 = vector.load %arg7[%c0_20, %c0_21] : memref<1x32xf32, #tpu.memory_space<vmem>>, vector<1x32xf32>
    %37 = vector.broadcast %36 : vector<1x32xf32> to vector<8x32xf32>
    %38 = arith.addf %35, %37 : vector<8x32xf32>
    %c0_22 = arith.constant 0 : index
    %c0_23 = arith.constant 0 : index
    %39 = vector.load %arg8[%c0_22, %c0_23] : memref<8x32xf32, #tpu.memory_space<vmem>>, vector<8x32xf32>
    tpu.vector_store %arg8[%c0_22, %c0_23], %38 {strides = array<i32>} : memref<8x32xf32, #tpu.memory_space<vmem>>, vector<8x32xf32>,
    return
  }
  func.func @transform_0(%arg0: i32) -> (i32, i32) {
    %c0_i32 = arith.constant 0 : i32
    %c0_i32_0 = arith.constant 0 : i32
    return %arg0, %c0_i32 : i32, i32
  }
  func.func @transform_1(%arg0: i32) -> (i32, i32) {
    %c0_i32 = arith.constant 0 : i32
    %c0_i32_0 = arith.constant 0 : i32
    %c0_i32_1 = arith.constant 0 : i32
    return %c0_i32, %c0_i32_0 : i32, i32
  }
  func.func @transform_2(%arg0: i32) -> (i32, i32) {
    %c0_i32 = arith.constant 0 : i32
    %c0_i32_0 = arith.constant 0 : i32
    %c0_i32_1 = arith.constant 0 : i32
    return %c0_i32, %c0_i32_0 : i32, i32
  }
  func.func @transform_3(%arg0: i32) -> (i32, i32) {
    %c0_i32 = arith.constant 0 : i32
    %c0_i32_0 = arith.constant 0 : i32
    %c0_i32_1 = arith.constant 0 : i32
    return %c0_i32, %c0_i32_0 : i32, i32
  }
  func.func @transform_4(%arg0: i32) -> (i32, i32) {
    %c0_i32 = arith.constant 0 : i32
    %c0_i32_0 = arith.constant 0 : i32
    %c0_i32_1 = arith.constant 0 : i32
    return %c0_i32, %c0_i32_0 : i32, i32
  }
  func.func @transform_5(%arg0: i32) -> (i32, i32) {
    %c0_i32 = arith.constant 0 : i32
    %c0_i32_0 = arith.constant 0 : i32
    %c0_i32_1 = arith.constant 0 : i32
    return %c0_i32, %c0_i32_0 : i32, i32
  }
  func.func @transform_6(%arg0: i32) -> (i32, i32) {
    %c0_i32 = arith.constant 0 : i32
    %c0_i32_0 = arith.constant 0 : i32
    %c0_i32_1 = arith.constant 0 : i32
    return %c0_i32, %c0_i32_0 : i32, i32
  }
  func.func @transform_7(%arg0: i32) -> (i32, i32) {
    %c0_i32 = arith.constant 0 : i32
    %c0_i32_0 = arith.constant 0 : i32
    return %arg0, %c0_i32 : i32, i32
  }
}

</mosaic_0001>

<bundles_post_ra>
// kernel: decoder_layer_forward.6
= control target key start
LH: loop header
LB: loop body
LE: loop exit
PB: predicated region body
PF: predicated region fallthrough
CT: control target
= control target key end

     0   :  { %s517_s21 = smov 0   ;;  %s561_s0 = inlined_call_operand.vmem [shape: f32[16,32], index: 0, kind: input, shape index: {}]   ;;  %s562_s1 = inlined_call_operand.vmem [shape: f32[16,32], index: 1, kind: input, shape index: {}]   ;;  %s563_s2 = inlined_call_operand.vmem [shape: bf16[32,32], index: 2, kind: input, shape index: {}]   ;;  %s564_s3 = inlined_call_operand.vmem [shape: f32[1,32], index: 3, kind: input, shape index: {}]   ;;  %s565_s4 = inlined_call_operand.vmem [shape: f32[1,32], index: 4, kind: input, shape index: {}]   ;;  %s566_s5 = inlined_call_operand.vmem [shape: f32[1,32], index: 5, kind: input, shape index: {}]   ;;  %s567_s6 = inlined_call_operand.vmem [shape: f32[16,32], index: 6, kind: output, shape index: {}]  }
   0x1 LB: > { %s431_s22 = sadd.s32 4294967295, %s478_s21   ;;  %p435_p0 = scmp.ge.s32.totalorder %s478_s21, 1  ;;  %s478_s21 = sphi %s517_s21, %s16_s21  }
   0x2   : > { %p220_p1 = scmp.lt.s32.totalorder %s478_s21, 3 }
   0x4   : > { %p221_p2 = pnand %p435_p0, %p220_p1 }
   0x5   : > { %v468_v0 = vld [vmem:[%s563_s2] sm:$0xff] (!%p221_p2)   ;;  %v480_v1 = vmov (!%p221_p2), 0.0   ;;  %v469_v2 = vld [vmem:[%s563_s2 + $0x8] sm:$0xff] (!%p221_p2)   ;;  %vm481_vm0 = vmmov (!%p221_p2), 0   ;;  %p252_p3 = scmp.lt.s32.totalorder (!%p221_p2), %s431_s22, 1  ;;  %vm290_vm1 = vcmask (!%p221_p2), 261120  }
   0x6   : > { %224 = sbr.rel (%p221_p2) target bundleno = 549 (0x225), region = 44  ;;  %450 = vmatprep.subr.bf16.mxu0 (!%p221_p2), %v480_v1  ;;  %454 = vmatprep.mubr.msk.bf16.mxu0 (!%p221_p2), %vm481_vm0, %v480_v1  ;;  %v439_v5 = vld [vmem:[%s564_s3] ss:$0 sm:$0xff] (!%p221_p2) }
   0x7   : > { %451 = vmatpush3.bf16.msra.mxu0 (!%p221_p2), %v468_v0  ;;  %v443_v23 = vld [vmem:[%s565_s4] ss:$0 sm:$0xff] (!%p221_p2) }
   0x8   : > { %452 = vmatprep.subr.bf16.mxu0 (!%p221_p2), %v480_v1  ;;  %v444_v25 = vld [vmem:[%s566_s5] ss:$0 sm:$0xff] (!%p221_p2) }
   0xb   : > { %453 = vmatpush3.bf16.msra.mxu0 (!%p221_p2), %v469_v2 }
   0xd   : > { %s569_s22 = smov (!%p252_p3, %s431_s22), 1 }
   0xe   : > { %s531_s27 = sshll.u32 %s569_s22, 3 }
   0xf   : > { %s255_s30 = scalar_lea.vmem %s561_s0, %s531_s27  ;;  %s259_s9 = scalar_lea.vmem %s562_s1, %s531_s27 }
  0x10   : > { %v265_v3 = vld [vmem:[%s255_s30] sm:$0xff]  ;;  %s263_s18 = scalar_lea.vmem %s567_s6, %s531_s27 }
  0x11   : > { %v266_v4 = vpack.c.bf16 %v265_v3, %v265_v3  ;;  %v334_v7 = vld [vmem:[%s259_s9] sm:$0xff] }
  0x13   : > { %455 = vmatmul.mubr.msk.bf16.vlgmr.msra.gmra.mrb[0].mxu0 %vm290_vm1, %v266_v4 }
  0xe6   : > { %v328_v6 = vpop.f32.mrb[0].mxu0 }
  0xe7   : > { %v329_v8 = vadd.f32 %v439_v5, %v328_v6  ;;  %v456_v9 = vpop.f32.mrb[1].mxu0 }
  0xe8   : > { %v331_v10 = vpop.f32.mrb[2].mxu0 }
  0xe9   : > { %v457_v11 = vpop.f32.mrb[3].mxu0  ;;  %v335_v12 = vadd.f32 %v334_v7, %v329_v8 }
  0xeb   : > { %v336_v13 = vsel %vm290_vm1, %v335_v12, 0.0 }
  0xec   : > { %337 = vadd.xlane.f32.xlu0 %v336_v13 }
 0x179   : > { %v338_v14 = vpop.xlane.xlu0 %337 }
 0x17a   : > { %v339_v15 = vmul.f32 0.03125, %v338_v14 }
 0x17c   : > { %v340_v16 = vsub.f32 %v335_v12, %v339_v15 }
 0x17e   : > { %v341_v17 = vmul.f32 %v340_v16, %v340_v16 }
 0x180   : > { %v342_v18 = vsel %vm290_vm1, %v341_v17, 0.0 }
 0x181   : > { %343 = vadd.xlane.f32.xlu0 %v342_v18 }
 0x20e   : > { %v344_v19 = vpop.xlane.xlu0 %343 }
 0x20f   : > { %v345_v20 = vmul.f32 0.03125, %v344_v19 }
 0x211   : > { %v346_v21 = vadd.f32 1e-05, %v345_v20 }
 0x213   : > { %470 = vrsqrt.f32 %v346_v21 }
 0x21d   : > { %v471_v22 = vpop.eup %470 }
 0x21e   : > { %v348_v24 = vmul.f32 %v471_v22, %v340_v16 }
 0x220   : > { %v356_v26 = vmul.f32 %v443_v23, %v348_v24 }
 0x222   : > { %v364_v27 = vadd.f32 %v444_v25, %v356_v26 }
 0x224   : > { %365 = vst.msk [vmem:[%s263_s18] sm:$0xff] %vm290_vm1, %v364_v27 }
 0x225 PF: > { %s16_s21 = sadd.s32 1, %s478_s21  }
 0x226   : > { %p13_p4 = scmp.ge.s32.totalorder %s16_s21, 4  }
 0x228   :  { %15 = sbr.rel (!%p13_p4) target bundleno = 1 (0x1), region = 77 }

// kernel: decoder_layer_forward.5
= control target key start
LH: loop header
LB: loop body
LE: loop exit
PB: predicated region body
PF: predicated region fallthrough
CT: control target
= control target key end

     0   :  { %s933_s12 = smov 0   ;;  %s1033_s0 = inlined_call_operand.vmem [shape: f32[2,8,32], index: 0, kind: input, shape index: {}]   ;;  %s1034_s1 = inlined_call_operand.vmem [shape: bf16[32,96], index: 1, kind: input, shape index: {}]   ;;  %s1035_s2 = inlined_call_operand.vmem [shape: f32[1,96], index: 2, kind: input, shape index: {}]   ;;  %s1036_s3 = inlined_call_operand.vmem [shape: f32[2,32,8], index: 3, kind: output, shape index: {}]  }
   0x1 LB: > { %s753_s13 = sadd.s32 4294967295, %s897_s12   ;;  %p757_p0 = scmp.ge.s32.totalorder %s897_s12, 1  ;;  %s897_s12 = sphi %s933_s12, %s13_s12  }
   0x2   : > { %p136_p1 = scmp.lt.s32.totalorder %s897_s12, 3 }
   0x4   : > { %p137_p2 = pnand %p757_p0, %p136_p1 }
   0x5   : > { %v873_v0 = vld [vmem:[%s1034_s1] sm:$0xff] (!%p137_p2)   ;;  %v899_v1 = vmov (!%p137_p2), 0.0   ;;  %v874_v2 = vld [vmem:[%s1034_s1 + $0x8] sm:$0xff] (!%p137_p2)   ;;  %vm900_vm0 = vmmov (!%p137_p2), 0   ;;  %p159_p3 = scmp.lt.s32.totalorder (!%p137_p2), %s753_s13, 1  ;;  %vm194_vm1 = vcmask (!%p137_p2), 261120   ;;  %v238_v23 = vlaneseq (!%p137_p2) }
   0x6   : > { %140 = sbr.rel (%p137_p2) target bundleno = 1167 (0x48f), region = 32  ;;  %795 = vmatprep.subr.bf16.mxu0 (!%p137_p2), %v899_v1  ;;  %803 = vmatprep.subr.bf16.mxu1 (!%p137_p2), %v899_v1  ;;  %v761_v5 = vld [vmem:[%s1035_s2] ss:$0 sm:$0xff] (!%p137_p2)  ;;  %s901_s24 = smov (!%p137_p2), 104   ;;  %vm248_vm2 = vcmask (!%p137_p2), 64512   ;;  %vm314_vm4 = vcmask (!%p137_p2), 1043456  }
   0x7   : > { %796 = vmatpush3.bf16.msra.mxu0 (!%p137_p2), %v873_v0  ;;  %799 = vmatprep.mubr.msk.bf16.mxu0 (!%p137_p2), %vm900_vm0, %v899_v1  ;;  %s902_s25 = smov (!%p137_p2), 120   ;;  %s903_s26 = smov (!%p137_p2), 72   ;;  %v239_v24 = vshrl.u32 (!%p137_p2), %v238_v23, 7  ;;  %v241_v25 = vand.u32 (!%p137_p2), 127, %v238_v23  ;;  %v908_v27 = vmov (!%p137_p2), -1e+09  }
   0x8   : > { %797 = vmatprep.subr.bf16.mxu0 (!%p137_p2), %v899_v1  ;;  %805 = vmatprep.mubr.msk.bf16.mxu1 (!%p137_p2), %vm900_vm0, %v899_v1  ;;  %s904_s27 = smov (!%p137_p2), 96   ;;  %s905_s28 = smov (!%p137_p2), 48  }
   0x9   : > { %s906_s29 = smov (!%p137_p2), 80   ;;  %s907_s30 = smov (!%p137_p2), 56   ;;  %vm242_vm3 = vcmp.le.s32.totalorder (!%p137_p2), %v241_v25, %v239_v24 }
   0xa   : > { %v243_v28 = vsel (!%p137_p2), %vm242_vm3, 0.0, %v908_v27  ;;  %s909_s4 = smov (!%p137_p2), 88   ;;  %s910_s5 = smov (!%p137_p2), 112  }
   0xb   : > { %798 = vmatpush3.bf16.msra.mxu0 (!%p137_p2), %v874_v2  ;;  %s911_s6 = smov (!%p137_p2), 40   ;;  %s912_s7 = smov (!%p137_p2), 64  }
   0xc   : > { %809 = vmatprep.subr.bf16.mxu0 (!%p137_p2), %v899_v1 }
   0xd   : > { %s1038_s13 = smov (!%p159_p3, %s753_s13), 1 }
   0xe   : > { %s758_s18 = sshll.u32 %s1038_s13, 3  ;;  %s775_s8 = sshll.u32 %s1038_s13, 5 }
   0xf   : > { %s162_s21 = scalar_lea.vmem %s1033_s0, %s758_s18  ;;  %s167_s11 = scalar_lea.vmem %s1036_s3, %s775_s8 }
  0x10   : > { %v169_v3 = vld [vmem:[%s162_s21] sm:$0xff] }
  0x11   : > { %v170_v4 = vpack.c.bf16 %v169_v3, %v169_v3 }
  0x13   : > { %800 = vmatmul.mubr.msk.bf16.vlgmr.msra.gmra.mrb[0].mxu0 %vm194_vm1, %v170_v4 }
  0x14   : > { %811 = vmatprep.mubr.msk.bf16.mxu0 %vm900_vm0, %v899_v1 }
  0xe6   : > { %v232_v6 = vpop.f32.mrb[0].mxu0 }
  0xe7   : > { %v233_v7 = vadd.f32 %v761_v5, %v232_v6  ;;  %v801_v8 = vpop.f32.mrb[1].mxu0 }
  0xe8   : > { %v235_v9 = vpop.f32.mrb[2].mxu0 }
  0xe9   : > { %v966_v10 = vpack.c.bf16 %v233_v7, %v233_v7  ;;  %v802_v11 = vpop.f32.mrb[3].mxu0 }
  0xeb   : > { %359 = vrot.lane.b32.xlu1 %v966_v10, %s901_s24  ;;  %246 = vrot.lane.b32.xlu0 %v966_v10, %s902_s25 }
  0xef   : > { %474 = vrot.lane.b32.xlu1 %v966_v10, %s903_s26  ;;  %361 = vrot.lane.b32.xlu0 %v966_v10, %s904_s27 }
  0xf3   : > { %587 = vrot.lane.b32.xlu1 %v966_v10, %s905_s28  ;;  %472 = vrot.lane.b32.xlu0 %v966_v10, %s906_s29 }
  0xf7   : > { %585 = vrot.lane.b32.xlu0 %v966_v10, %s907_s30 }
 0x15d   : > { %v247_v12 = vpop.permute.xlu0 %246  ;;  %v360_v15 = vpop.permute.xlu1 %359 }
 0x15e   : > { %v253_v13 = vsel %vm248_vm2, %v247_v12, 0 }
 0x15f   : > { %804 = vmatpush3.bf16.xpose.msra.mxu1 %v253_v13 }
 0x160   : > { %815 = vmatprep.subr.bf16.mxu1 %v899_v1 }
 0x161   : > { %v362_v14 = vpop.permute.xlu0 %361  ;;  %v475_v17 = vpop.permute.xlu1 %474 }
 0x162   : > { %v367_v16 = vsel %vm248_vm2, %v362_v14, 0  ;;  %v480_v18 = vsel %vm248_vm2, %v475_v17, 0 }
 0x165   : > { %v588_v19 = vpop.permute.xlu1 %587  ;;  %v473_v20 = vpop.permute.xlu0 %472 }
 0x166   : > { %806 = vmatmul.mubr.msk.bf16.vlgmr.msra.gmra.mrb[0].mxu1 %vm248_vm2, %v966_v10  ;;  %v593_v21 = vsel %vm248_vm2, %v588_v19, 0 }
 0x167   : > { %816 = vmatpush3.bf16.xpose.msra.mxu1 %v367_v16  ;;  %817 = vmatprep.mubr.msk.bf16.mxu1 %vm900_vm0, %v899_v1 }
 0x168   : > { %827 = vmatprep.subr.bf16.mxu1 %v899_v1 }
 0x169   : > { %v586_v22 = vpop.permute.xlu0 %585 }
 0x16e   : > { %818 = vmatmul.mubr.msk.bf16.vlgmr.msra.gmra.mrb[4].mxu1 %vm248_vm2, %v360_v15 }
 0x16f   : > { %828 = vmatpush3.bf16.xpose.msra.mxu1 %v480_v18  ;;  %829 = vmatprep.mubr.msk.bf16.mxu1 %vm900_vm0, %v899_v1 }
 0x170   : > { %839 = vmatprep.subr.bf16.mxu1 %v899_v1 }
 0x176   : > { %830 = vmatmul.mubr.msk.bf16.vlgmr.msra.gmra.mrb[8].mxu1 %vm248_vm2, %v473_v20 }
 0x177   : > { %840 = vmatpush3.bf16.xpose.msra.mxu1 %v593_v21  ;;  %841 = vmatprep.mubr.msk.bf16.mxu1 %vm900_vm0, %v899_v1 }
 0x17e   : > { %842 = vmatmul.mubr.msk.bf16.vlgmr.msra.gmra.mrb[12].mxu1 %vm248_vm2, %v586_v22 }
 0x239   : > { %v289_v26 = vpop.f32.mrb[0].mxu1 }
 0x23a   : > { %v295_v29 = vmul.f32 0.35355338, %v289_v26  ;;  %v807_v30 = vpop.f32.mrb[1].mxu1 }
 0x23b   : > { %v292_v31 = vpop.f32.mrb[2].mxu1 }
 0x23c   : > { %v808_v32 = vpop.f32.mrb[3].mxu1  ;;  %v296_v33 = vadd.f32 %v295_v29, %v243_v28 }
 0x23e   : > { %v297_v34 = vsel %vm248_vm2, %v296_v33, -inf }
 0x23f   : > { %298 = vmax.xlane.f32.xlu1 %v297_v34 }
 0x241   : > { %v403_v35 = vpop.f32.mrb[4].mxu1 }
 0x242   : > { %v409_v36 = vmul.f32 0.35355338, %v403_v35  ;;  %v819_v37 = vpop.f32.mrb[5].mxu1 }
 0x243   : > { %v406_v38 = vpop.f32.mrb[6].mxu1 }
 0x244   : > { %v820_v39 = vpop.f32.mrb[7].mxu1  ;;  %v410_v40 = vadd.f32 %v409_v36, %v243_v28 }
 0x246   : > { %v411_v41 = vsel %vm248_vm2, %v410_v40, -inf }
 0x247   : > { %412 = vmax.xlane.f32.xlu0 %v411_v41 }
 0x249   : > { %v516_v42 = vpop.f32.mrb[8].mxu1 }
 0x24a   : > { %v522_v43 = vmul.f32 0.35355338, %v516_v42  ;;  %v831_v44 = vpop.f32.mrb[9].mxu1 }
 0x24b   : > { %v519_v45 = vpop.f32.mrb[10].mxu1 }
 0x24c   : > { %v832_v46 = vpop.f32.mrb[11].mxu1  ;;  %v523_v47 = vadd.f32 %v522_v43, %v243_v28 }
 0x24e   : > { %v524_v48 = vsel %vm248_vm2, %v523_v47, -inf }
 0x24f   : > { %525 = vmax.xlane.f32.xlu0 %v524_v48 }
 0x251   : > { %v629_v49 = vpop.f32.mrb[12].mxu1 }
 0x252   : > { %v635_v50 = vmul.f32 0.35355338, %v629_v49  ;;  %v843_v51 = vpop.f32.mrb[13].mxu1 }
 0x253   : > { %v632_v52 = vpop.f32.mrb[14].mxu1 }
 0x254   : > { %v844_v53 = vpop.f32.mrb[15].mxu1  ;;  %v636_v54 = vadd.f32 %v635_v50, %v243_v28 }
 0x256   : > { %v637_v55 = vsel %vm248_vm2, %v636_v54, -inf }
 0x257   : > { %638 = vmax.xlane.f32.xlu1 %v637_v55 }
 0x2cc   : > { %v299_v56 = vpop.xlane.xlu1 %298 }
 0x2cd   : > { %v300_v57 = vsub.f32 %v296_v33, %v299_v56 }
 0x2cf   : > { %v301_v58 = vmul.f32 1.442695, %v300_v57 }
 0x2d1   : > { %875 = vpow2.f32 %v301_v58 }
 0x2d4   : > { %v413_v59 = vpop.xlane.xlu0 %412 }
 0x2d5   : > { %v414_v60 = vsub.f32 %v410_v40, %v413_v59 }
 0x2d7   : > { %v415_v61 = vmul.f32 1.442695, %v414_v60 }
 0x2d9   : > { %877 = vpow2.f32 %v415_v61 }
 0x2db   : > { %v876_v62 = vpop.eup %875 }
 0x2dc   : > { %v526_v63 = vpop.xlane.xlu0 %525  ;;  %v303_v0 = vsel %vm248_vm2, %v876_v62, 0.0 }
 0x2dd   : > { %v527_v2 = vsub.f32 %v523_v47, %v526_v63  ;;  %304 = vadd.xlane.f32.xlu0 %v303_v0 }
 0x2df   : > { %v528_v3 = vmul.f32 1.442695, %v527_v2 }
 0x2e1   : > { %879 = vpow2.f32 %v528_v3 }
 0x2e3   : > { %v878_v4 = vpop.eup %877 }
 0x2e4   : > { %v417_v5 = vsel %vm248_vm2, %v878_v4, 0.0  ;;  %v639_v8 = vpop.xlane.xlu1 %638 }
 0x2e5   : > { %418 = vadd.xlane.f32.xlu1 %v417_v5  ;;  %v640_v9 = vsub.f32 %v636_v54, %v639_v8 }
 0x2e7   : > { %v641_v11 = vmul.f32 1.442695, %v640_v9 }
 0x2e9   : > { %881 = vpow2.f32 %v641_v11 }
 0x2eb   : > { %v880_v6 = vpop.eup %879 }
 0x2ec   : > { %v530_v7 = vsel %vm248_vm2, %v880_v6, 0.0 }
 0x2ed   : > { %531 = vadd.xlane.f32.xlu0 %v530_v7 }
 0x2f3   : > { %v882_v12 = vpop.eup %881 }
 0x2f4   : > { %v643_v13 = vsel %vm248_vm2, %v882_v12, 0.0 }
 0x2f6   : > { %423 = vrot.lane.b32.xlu1 %v966_v10, %s909_s4 }
 0x303   : > { %309 = vrot.lane.b32.xlu0 %v966_v10, %s910_s5 }
 0x307   : > { %649 = vrot.lane.b32.xlu0 %v966_v10, %s911_s6 }
 0x31a   : > { %644 = vadd.xlane.f32.xlu1 %v643_v13 }
 0x32b   : > { %536 = vrot.lane.b32.xlu1 %v966_v10, %s912_s7 }
 0x36a   : > { %v305_v14 = vpop.xlane.xlu0 %304 }
 0x36b   : > { %883 = vrcp.f32 %v305_v14 }
 0x372   : > { %v419_v15 = vpop.xlane.xlu1 %418 }
 0x373   : > { %885 = vrcp.f32 %v419_v15 }
 0x375   : > { %v884_v16 = vpop.eup %883 }
 0x376   : > { %v307_v18 = vmul.f32 %v884_v16, %v876_v62  ;;  %v424_v21 = vpop.permute.xlu1 %423 }
 0x377   : > { %v429_v24 = vsel %vm314_vm4, %v424_v21, 0 }
 0x378   : > { %v308_v22 = vpack.c.bf16 %v307_v18, %v307_v18 }
 0x37a   : > { %v532_v17 = vpop.xlane.xlu0 %531 }
 0x37b   : > { %887 = vrcp.f32 %v532_v17 }
 0x37d   : > { %v886_v23 = vpop.eup %885 }
 0x37e   : > { %v310_v19 = vpop.permute.xlu0 %309  ;;  %v421_v10 = vmul.f32 %v886_v23, %v878_v4 }
 0x37f   : > { %v316_v20 = vsel %vm314_vm4, %v310_v19, 0 }
 0x380   : > { %810 = vmatpush3.bf16.msra.mxu0 %v316_v20  ;;  %v422_v25 = vpack.c.bf16 %v421_v10, %v421_v10 }
 0x381   : > { %821 = vmatprep.subr.bf16.mxu0 %v899_v1 }
 0x382   : > { %v650_v31 = vpop.permute.xlu0 %649 }
 0x383   : > { %812 = vmatmul.mubr.msk.bf16.vlgmr.msra.gmra.mrb[4].mxu0 %vm248_vm2, %v308_v22  ;;  %v655_v33 = vsel %vm314_vm4, %v650_v31, 0 }
 0x384   : > { %822 = vmatpush3.bf16.msra.mxu0 %v429_v24  ;;  %823 = vmatprep.mubr.msk.bf16.mxu0 %vm900_vm0, %v899_v1 }
 0x385   : > { %833 = vmatprep.subr.bf16.mxu0 %v899_v1  ;;  %v888_v26 = vpop.eup %887 }
 0x386   : > { %v534_v28 = vmul.f32 %v888_v26, %v880_v6 }
 0x388   : > { %v535_v32 = vpack.c.bf16 %v534_v28, %v534_v28 }
 0x38b   : > { %824 = vmatmul.mubr.msk.bf16.vlgmr.msra.gmra.mrb[8].mxu0 %vm248_vm2, %v422_v25 }
 0x38c   : > { %835 = vmatprep.mubr.msk.bf16.mxu0 %vm900_vm0, %v899_v1 }
 0x3a7   : > { %v645_v27 = vpop.xlane.xlu1 %644 }
 0x3a8   : > { %889 = vrcp.f32 %v645_v27 }
 0x3ab   : > { %v537_v29 = vpop.permute.xlu1 %536 }
 0x3ac   : > { %v542_v30 = vsel %vm314_vm4, %v537_v29, 0 }
 0x3ad   : > { %834 = vmatpush3.bf16.msra.mxu0 %v542_v30 }
 0x3ae   : > { %845 = vmatprep.subr.bf16.mxu0 %v899_v1 }
 0x3b0   : > { %836 = vmatmul.mubr.msk.bf16.vlgmr.msra.gmra.mrb[12].mxu0 %vm248_vm2, %v535_v32 }
 0x3b1   : > { %846 = vmatpush3.bf16.msra.mxu0 %v655_v33  ;;  %847 = vmatprep.mubr.msk.bf16.mxu0 %vm900_vm0, %v899_v1 }
 0x3b2   : > { %v890_v34 = vpop.eup %889 }
 0x3b3   : > { %v647_v35 = vmul.f32 %v890_v34, %v882_v12 }
 0x3b5   : > { %v648_v36 = vpack.c.bf16 %v647_v35, %v647_v35 }
 0x3b8   : > { %848 = vmatmul.mubr.msk.bf16.vlgmr.msra.gmra.mrb[16].mxu0 %vm248_vm2, %v648_v36 }
 0x456   : > { %v352_v37 = vpop.f32.mrb[4].mxu0 }
 0x457   : > { %358 = vst.msk [vmem:[%s167_s11] sm:$0xff] %vm248_vm2, %v352_v37  ;;  %v813_v38 = vpop.f32.mrb[5].mxu0 }
 0x458   : > { %v355_v39 = vpop.f32.mrb[6].mxu0 }
 0x459   : > { %v814_v40 = vpop.f32.mrb[7].mxu0 }
 0x45e   : > { %v465_v41 = vpop.f32.mrb[8].mxu0 }
 0x45f   : > { %471 = vst.msk [vmem:[%s167_s11 + $0x8] sm:$0xff] %vm248_vm2, %v465_v41  ;;  %v825_v1 = vpop.f32.mrb[9].mxu0 }
 0x460   : > { %v468_v42 = vpop.f32.mrb[10].mxu0 }
 0x461   : > { %v826_v43 = vpop.f32.mrb[11].mxu0 }
 0x483   : > { %v578_v44 = vpop.f32.mrb[12].mxu0 }
 0x484   : > { %584 = vst.msk [vmem:[%s167_s11 + $0x10] sm:$0xff] %vm248_vm2, %v578_v44  ;;  %v837_v45 = vpop.f32.mrb[13].mxu0 }
 0x485   : > { %v581_v46 = vpop.f32.mrb[14].mxu0 }
 0x486   : > { %v838_v47 = vpop.f32.mrb[15].mxu0 }
 0x48b   : > { %v691_v48 = vpop.f32.mrb[16].mxu0 }
 0x48c   : > { %697 = vst.msk [vmem:[%s167_s11 + $0x18] sm:$0xff] %vm248_vm2, %v691_v48  ;;  %v849_v49 = vpop.f32.mrb[17].mxu0 }
 0x48d   : > { %v694_v50 = vpop.f32.mrb[18].mxu0 }
 0x48e   : > { %v850_v51 = vpop.f32.mrb[19].mxu0 }
 0x48f PF: > { %s13_s12 = sadd.s32 1, %s897_s12  }
 0x490   : > { %p10_p4 = scmp.ge.s32.totalorder %s13_s12, 4  }
 0x492   :  { %12 = sbr.rel (!%p10_p4) target bundleno = 1 (0x1), region = 62 }

// kernel: decoder_layer_forward.9
= control target key start
LH: loop header
LB: loop body
LE: loop exit
PB: predicated region body
PF: predicated region fallthrough
CT: control target
= control target key end

     0   :  { %12 = vsyncpa [#allocation3], 0  ;;  %s873_s0 = inlined_call_operand.vmem [shape: f32[16,32], index: 0, kind: input, shape index: {}]   ;;  %s874_s1 = inlined_call_operand.vmem [shape: bf16[32,64], index: 1, kind: input, shape index: {}]   ;;  %s875_s2 = inlined_call_operand.vmem [shape: f32[1,64], index: 2, kind: input, shape index: {}]   ;;  %s876_s3 = inlined_call_operand.vmem [shape: bf16[64,32], index: 3, kind: input, shape index: {}]   ;;  %s877_s4 = inlined_call_operand.vmem [shape: f32[1,32], index: 4, kind: input, shape index: {}]   ;;  %s878_s5 = inlined_call_operand.vmem [shape: f32[1,32], index: 5, kind: input, shape index: {}]   ;;  %s879_s6 = inlined_call_operand.vmem [shape: f32[1,32], index: 6, kind: input, shape index: {}]   ;;  %s880_s7 = inlined_call_operand.hbm [shape: f32[16,32], index: 7, kind: output, shape index: {}]  }
   0x1   :  { %14 = vsyncpa [#allocation3 + $0x1], 0  ;;  %s739_s24 = smov 0   ;;  %s741_s25 = smov 0  }
   0x2   :  { %s743_s26 = smov 0   ;;  %s745_s27 = smov 0  }
   0x3 LB: > { %s760_s28 = sadd.s32 4294967295, %s694_s27   ;;  %s533_s29 = sadd.s32 4294967294, %s694_s27   ;;  %s694_s27 = sphi %s745_s27, %s886_s27   ;;  %s690_s26 = sphi %s743_s26, %s885_s26   ;;  %s686_s25 = sphi %s741_s25, %s884_s25   ;;  %s682_s24 = sphi %s739_s24, %s883_s24  }
   0x4   : > { %s764_s30 = sadd.s32 1, %s694_s27   ;;  %s179_s8 = sadd.s32 1, %s690_s26 }
   0x5   : > { %s176_s9 = ssub.s32 %s694_s27, %s764_s30  ;;  %p189_p0 = scmp.ne.s32.totalorder %s690_s26, %s686_s25 }
   0x6   : > { %p177_p1 = scmp.eq.s32.totalorder %s176_s9, 0  ;;  %p190_p2 = scmp.eq.s32.totalorder %s760_s28, 1 }
   0x7   : > { %p195_p3 = scmp.ne.s32.totalorder %s686_s25, %s682_s24  ;;  %p196_p4 = scmp.eq.s32.totalorder %s533_s29, 1 }
   0x8   : > { %s775_s10 = scalar_select %p177_p1, %s690_s26, %s179_s8  }
   0x9   : > { %p777_p5 = por %p190_p2, %p189_p0  ;;  %p781_p6 = por %p196_p4, %p195_p3 }
   0xa   : > { %p536_p7 = scmp.ge.s32.totalorder %s694_s27, 1  ;;  %p239_p8 = scmp.lt.s32.totalorder %s694_s27, 3 }
   0xc   : > { %p240_p9 = pnand %p536_p7, %p239_p8 }
   0xd   : > { %v624_v0 = vld [vmem:[%s874_s1] sm:$0xff] (!%p240_p9)   ;;  %v696_v1 = vmov (!%p240_p9), 0.0   ;;  %v625_v2 = vld [vmem:[%s874_s1 + $0x8] sm:$0xff] (!%p240_p9)   ;;  %vm697_vm0 = vmmov (!%p240_p9), 0   ;;  %p270_p10 = scmp.lt.s32.totalorder (!%p240_p9), %s760_s28, 1  ;;  %vm300_vm1 = vcmask (!%p240_p9), 261120  }
   0xe   : > { %243 = sbr.rel (%p240_p9) target bundleno = 789 (0x315), region = 48  ;;  %563 = vmatprep.subr.bf16.mxu0 (!%p240_p9), %v696_v1  ;;  %571 = vmatprep.subr.bf16.mxu1 (!%p240_p9), %v696_v1  ;;  %v626_v3 = vld [vmem:[%s876_s3] sm:$0xff] (!%p240_p9)   ;;  %v627_v4 = vld [vmem:[%s876_s3 + $0x8] sm:$0xff] (!%p240_p9)   ;;  %v628_v7 = vld [vmem:[%s876_s3 + $0x10] sm:$0xff] (!%p240_p9)   ;;  %vm385_vm2 = vcmask (!%p240_p9), 523264   ;;  %s267_s20 = sand.u32 (!%p240_p9), 1, %s686_s25  }
   0xf   : > { %564 = vmatpush3.bf16.msra.mxu0 (!%p240_p9), %v624_v0  ;;  %567 = vmatprep.mubr.msk.bf16.mxu0 (!%p240_p9), %vm697_vm0, %v696_v1  ;;  %v629_v8 = vld [vmem:[%s876_s3 + $0x18] sm:$0xff] (!%p240_p9)   ;;  %v539_v9 = vld [vmem:[%s875_s2] ss:$0 sm:$0xff] (!%p240_p9)  ;;  %s537_s21 = sshll.u32 (!%p240_p9), %s267_s20, 3  ;;  %s552_s9 = sshll.u32 (!%p240_p9), %s760_s28, 7 }
  0x10   : > { %565 = vmatprep.subr.bf16.mxu0 (!%p240_p9), %v696_v1  ;;  %579 = vmatprep.mubr.msk.bf16.mxu1 (!%p240_p9), %vm697_vm0, %v696_v1  ;;  %v543_v17 = vld [vmem:[%s877_s4] ss:$0 sm:$0xff] (!%p240_p9)  ;;  %s269_s13 = scalar_lea.vmem (!%p240_p9), [#allocation2], %s537_s21  ;;  %s830_s17 = scalar_lea.hbm (!%p240_p9), %s880_s7, %s552_s9 }
  0x11   : > { %572 = vmatpush3.bf16.msra.mxu1 (!%p240_p9), %v626_v3  ;;  %v549_v34 = vld [vmem:[%s878_s5] ss:$0 sm:$0xff] (!%p240_p9)  ;;  %s474_s14 = sshll.u32 (!%p240_p9), %s269_s13, 4  ;;  %s461_s18 = scalar_lea.sflag (!%p240_p9), [#allocation3], %s267_s20  ;;  %s832_s14 = int_to_ptr.vmem [resolvable:$true] %s474_s14 }
  0x12   : > { %573 = vmatprep.subr.bf16.mxu1 (!%p240_p9), %v696_v1  ;;  %v550_v36 = vld [vmem:[%s879_s6] ss:$0 sm:$0xff] (!%p240_p9) }
  0x13   : > { %566 = vmatpush3.bf16.msra.mxu0 (!%p240_p9), %v625_v2 }
  0x15   : > { %s271_s19 = scalar_select %p270_p10, %s760_s28, 1  ;;  %574 = vmatpush3.bf16.msra.mxu1 %v627_v4 }
  0x16   : > { %575 = vmatprep.subr.bf16.mxu1 %v696_v1  ;;  %s698_s28 = smov [#allocation2]  }
  0x17   : > { %s538_s22 = sshll.u32 %s271_s19, 3  ;;  %s632_s19 = scalar_lea.vmem %s832_s14, 128 }
  0x18   : > { %s273_s8 = scalar_lea.vmem %s873_s0, %s538_s22  ;;  %p633_p11 = scmp.ne.s32.totalorder %s832_s14, %s632_s19 }
  0x19   : > { %v275_v5 = vld [vmem:[%s273_s8] sm:$0xff]  ;;  %576 = vmatpush3.bf16.msra.mxu1 %v628_v7  ;;  %s636_s21 = sshll.u32 %s698_s28, 4  ;;  %s637_s21 = int_to_ptr.vmem [resolvable:$false] %s636_s21 }
  0x1a   : > { %v276_v6 = vpack.c.bf16 %v275_v5, %v275_v5  ;;  %577 = vmatprep.subr.bf16.mxu1 %v696_v1  ;;  %p634_p12 = pnand %p633_p11, %p777_p5  ;;  %s638_s22 = scalar_lea.vmem %s637_s21, 256 }
  0x1b   : > { %p639_p0 = scmp.lt.s32.totalorder %s832_s14, %s637_s21  ;;  %p640_p1 = scmp.lt.s32.totalorder %s638_s22, %s632_s19 }
  0x1c   : > { %568 = vmatmul.mubr.msk.bf16.vlgmr.msra.gmra.mrb[0].mxu0 %vm300_vm1, %v276_v6  ;;  %p635_p13 = pneg %p634_p12 }
  0x1d   : > { %578 = vmatpush3.bf16.msra.mxu1 %v629_v8  ;;  %p641_p2 = por %p640_p1, %p639_p0 }
  0x1f   : > { %p642_p3 = pnand %p641_p2, %p635_p13 }
  0xef   : > { %v338_v10 = vpop.f32.mrb[0].mxu0 }
  0xf0   : > { %v339_v11 = vadd.f32 %v539_v9, %v338_v10  ;;  %v569_v12 = vpop.f32.mrb[1].mxu0 }
  0xf1   : > { %v341_v13 = vpop.f32.mrb[2].mxu0 }
  0xf2   : > { %v344_v14 = vmax.f32 %v339_v11, 0.0  ;;  %v570_v15 = vpop.f32.mrb[3].mxu0 }
  0xf4   : > { %v345_v16 = vpack.c.bf16 %v344_v14, %v344_v14 }
  0xf6   : > { %580 = vmatmul.mubr.msk.bf16.vlgmr.msra.gmra.mrb[0].mxu1 %vm385_vm2, %v345_v16 }
 0x1c9   : > { %v423_v18 = vpop.f32.mrb[0].mxu1 }
 0x1ca   : > { %v424_v19 = vadd.f32 %v543_v17, %v423_v18  ;;  %v581_v20 = vpop.f32.mrb[1].mxu1 }
 0x1cb   : > { %v426_v21 = vpop.f32.mrb[2].mxu1 }
 0x1cc   : > { %v582_v22 = vpop.f32.mrb[3].mxu1  ;;  %v429_v23 = vadd.f32 %v424_v19, %v275_v5 }
 0x1ce   : > { %v430_v24 = vsel %vm300_vm1, %v429_v23, 0.0 }
 0x1cf   : > { %431 = vadd.xlane.f32.xlu0 %v430_v24 }
 0x25c   : > { %v432_v25 = vpop.xlane.xlu0 %431 }
 0x25d   : > { %v433_v26 = vmul.f32 0.03125, %v432_v25 }
 0x25f   : > { %v434_v27 = vsub.f32 %v429_v23, %v433_v26 }
 0x261   : > { %v435_v28 = vmul.f32 %v434_v27, %v434_v27 }
 0x263   : > { %v436_v29 = vsel %vm300_vm1, %v435_v28, 0.0 }
 0x264   : > { %437 = vadd.xlane.f32.xlu0 %v436_v29 }
 0x2f1   : > { %v438_v30 = vpop.xlane.xlu0 %437 }
 0x2f2   : > { %v439_v31 = vmul.f32 0.03125, %v438_v30 }
 0x2f4   : > { %v440_v32 = vadd.f32 1e-05, %v439_v31 }
 0x2f6   : > { %630 = vrsqrt.f32 %v440_v32 }
 0x300   : > { %v631_v33 = vpop.eup %630 }
 0x301   : > { %v442_v35 = vmul.f32 %v631_v33, %v434_v27 }
 0x303   : > { %v450_v37 = vmul.f32 %v549_v34, %v442_v35 }
 0x305   : > { %v458_v38 = vadd.f32 %v550_v36, %v450_v37 }
 0x307   : > { %459 = vst.msk [vmem:[%s269_s13] sm:$0xff] %vm300_vm1, %v458_v38 }
 0x308   : > { %645 = shalt.err (!%p642_p3)
}
 0x309   : > { %s646_s20 = scalar_lea.hbm %s830_s17, 128  ;;  %s650_s8 = scalar_lea.hbm %s880_s7, 256 }
 0x30a   : > { %p647_p4 = scmp.ne.s32.totalorder %s830_s17, %s646_s20  ;;  %p651_p9 = scmp.lt.u32.totalorder %s830_s17, %s880_s7 }
 0x30b   : > { %p652_p10 = scmp.lt.u32.totalorder %s650_s8, %s646_s20  ;;  %p654_p12 = scmp.lt.u32.totalorder %s646_s20, %s830_s17 }
 0x30c   : > { %p648_p7 = pnand %p647_p4, %p777_p5 }
 0x30d   : > { %p653_p11 = por %p652_p10, %p651_p9 }
 0x30e   : > { %p649_p8 = pneg %p648_p7 }
 0x30f   : > { %p655_p13 = por %p654_p12, %p653_p11 }
 0x311   : > { %p656_p0 = pnand %p655_p13, %p649_p8 }
 0x313   : > { %659 = shalt.err (!%p656_p0)
}
 0x314   : > { %583 = dma.vmem_to_hbm [thread:$0]  (%p777_p5), %s832_s14, 128, %s830_s17, %s461_s18  }
 0x315 PF: > { %p589_p1 = scmp.ge.s32.totalorder %s694_s27, 2  ;;  %s486_s15 = sand.u32 1, %s682_s24  }
 0x316   : > { %s487_s16 = scalar_lea.sflag [#allocation3], %s486_s15 }
 0x317   : > { %p586_p2 = pnand %p589_p1, %p781_p6 }
 0x319   : > { %677 = dma.done.wait (!%p586_p2), %s487_s16, 128  }
 0x31a   : > { %679 = vsyncadd (!%p586_p2), %s487_s16, 4294967168  ;;  %p17_p3 = scmp.ge.s32.totalorder %s764_s30, 4   ;;  %s883_s24 = smov %s686_s25 }
 0x31b   : > { %s884_s25 = smov %s690_s26  ;;  %s885_s26 = smov %s775_s10 }
 0x31c   : > { %s886_s27 = smov %s764_s30  ;;  %19 = sbr.rel (!%p17_p3) target bundleno = 3 (0x3), region = 83 }
 0x323   :  { %492 = vsyncpa [#allocation3], 1 }
 0x324   :  { %494 = vsyncpa [#allocation3 + $0x1], 1 }

// kernel: decoder_layer_forward.7
= control target key start
LH: loop header
LB: loop body
LE: loop exit
PB: predicated region body
PF: predicated region fallthrough
CT: control target
= control target key end

     0   :  { %s1124_s21 = smov 0   ;;  %s1240_s0 = inlined_call_operand.vmem [shape: f32[2,8,32], index: 0, kind: input, shape index: {}]   ;;  %s1241_s1 = inlined_call_operand.vmem [shape: f32[2,8,32], index: 1, kind: input, shape index: {}]   ;;  %s1242_s2 = inlined_call_operand.vmem [shape: bf16[32,64], index: 2, kind: input, shape index: {}]   ;;  %s1243_s3 = inlined_call_operand.vmem [shape: f32[1,64], index: 3, kind: input, shape index: {}]   ;;  %s1244_s4 = inlined_call_operand.vmem [shape: bf16[32,32], index: 4, kind: input, shape index: {}]   ;;  %s1245_s5 = inlined_call_operand.vmem [shape: f32[1,32], index: 5, kind: input, shape index: {}]   ;;  %s1246_s6 = inlined_call_operand.vmem [shape: f32[2,32,8], index: 6, kind: output, shape index: {}]  }
   0x1 LB: > { %s921_s22 = sadd.s32 4294967295, %s1078_s21   ;;  %p925_p0 = scmp.ge.s32.totalorder %s1078_s21, 1  ;;  %s1078_s21 = sphi %s1124_s21, %s16_s21  }
   0x2   : > { %p220_p1 = scmp.lt.s32.totalorder %s1078_s21, 3 }
   0x4   : > { %p221_p2 = pnand %p925_p0, %p220_p1 }
   0x5   : > { %v1052_v0 = vld [vmem:[%s1242_s2] sm:$0xff] (!%p221_p2)   ;;  %v1080_v1 = vmov (!%p221_p2), 0.0   ;;  %v1053_v2 = vld [vmem:[%s1242_s2 + $0x8] sm:$0xff] (!%p221_p2)   ;;  %vm1081_vm0 = vmmov (!%p221_p2), 0   ;;  %p253_p3 = scmp.lt.s32.totalorder (!%p221_p2), %s921_s22, 1  ;;  %vm294_vm1 = vcmask (!%p221_p2), 261120  }
   0x6   : > { %224 = sbr.rel (%p221_p2) target bundleno = 1128 (0x468), region = 44  ;;  %971 = vmatprep.subr.bf16.mxu0 (!%p221_p2), %v1080_v1  ;;  %979 = vmatprep.subr.bf16.mxu1 (!%p221_p2), %v1080_v1  ;;  %v1054_v3 = vld [vmem:[%s1244_s4] sm:$0xff] (!%p221_p2)   ;;  %v1055_v4 = vld [vmem:[%s1244_s4 + $0x8] sm:$0xff] (!%p221_p2)   ;;  %vm406_vm2 = vcmask (!%p221_p2), 64512   ;;  %s1082_s18 = smov (!%p221_p2), 96   ;;  %vm472_vm3 = vcmask (!%p221_p2), 1043456  }
   0x7   : > { %972 = vmatpush3.bf16.msra.mxu0 (!%p221_p2), %v1052_v0  ;;  %975 = vmatprep.mubr.msk.bf16.mxu0 (!%p221_p2), %vm1081_vm0, %v1080_v1  ;;  %v930_v9 = vld [vmem:[%s1243_s3] ss:$0 sm:$0xff] (!%p221_p2)  ;;  %s1083_s19 = smov (!%p221_p2), 112   ;;  %s1084_s20 = smov (!%p221_p2), 120  }
   0x8   : > { %973 = vmatprep.subr.bf16.mxu0 (!%p221_p2), %v1080_v1  ;;  %983 = vmatprep.mubr.msk.bf16.mxu1 (!%p221_p2), %vm1081_vm0, %v1080_v1  ;;  %v934_v10 = vld [vmem:[%s1245_s5] ss:$0 sm:$0xff] (!%p221_p2)  ;;  %s1085_s23 = smov (!%p221_p2), 104   ;;  %s1086_s24 = smov (!%p221_p2), 80  }
   0x9   : > { %980 = vmatpush3.bf16.msra.mxu1 (!%p221_p2), %v1054_v3  ;;  %s1087_s25 = smov (!%p221_p2), 88   ;;  %s1088_s26 = smov (!%p221_p2), 72  }
   0xa   : > { %981 = vmatprep.subr.bf16.mxu1 (!%p221_p2), %v1080_v1 }
   0xb   : > { %974 = vmatpush3.bf16.msra.mxu0 (!%p221_p2), %v1053_v2 }
   0xc   : > { %987 = vmatprep.subr.bf16.mxu0 (!%p221_p2), %v1080_v1 }
   0xd   : > { %s1248_s22 = smov (!%p253_p3, %s921_s22), 1  ;;  %982 = vmatpush3.bf16.msra.mxu1 %v1055_v4 }
   0xe   : > { %s926_s7 = sshll.u32 %s1248_s22, 3  ;;  %993 = vmatprep.subr.bf16.mxu1 %v1080_v1  ;;  %s948_s27 = sshll.u32 %s1248_s22, 5 }
   0xf   : > { %s256_s10 = scalar_lea.vmem %s1240_s0, %s926_s7  ;;  %s260_s13 = scalar_lea.vmem %s1241_s1, %s926_s7 }
  0x10   : > { %v267_v5 = vld [vmem:[%s256_s10] sm:$0xff]  ;;  %s265_s30 = scalar_lea.vmem %s1246_s6, %s948_s27 }
  0x11   : > { %v269_v6 = vld [vmem:[%s260_s13] sm:$0xff]  ;;  %v268_v7 = vpack.c.bf16 %v267_v5, %v267_v5 }
  0x12   : > { %v270_v8 = vpack.c.bf16 %v269_v6, %v269_v6 }
  0x13   : > { %976 = vmatmul.mubr.msk.bf16.vlgmr.msra.gmra.mrb[0].mxu0 %vm294_vm1, %v268_v7 }
  0x14   : > { %984 = vmatmul.mubr.msk.bf16.vlgmr.msra.gmra.mrb[0].mxu1 %vm294_vm1, %v270_v8  ;;  %989 = vmatprep.mubr.msk.bf16.mxu0 %vm1081_vm0, %v1080_v1 }
  0x15   : > { %995 = vmatprep.mubr.msk.bf16.mxu1 %vm1081_vm0, %v1080_v1 }
  0xe6   : > { %v332_v11 = vpop.f32.mrb[0].mxu0 }
  0xe7   : > { %v398_v12 = vpop.f32.mrb[0].mxu1  ;;  %v333_v13 = vadd.f32 %v930_v9, %v332_v11  ;;  %v977_v14 = vpop.f32.mrb[1].mxu0 }
  0xe8   : > { %v399_v15 = vadd.f32 %v934_v10, %v398_v12  ;;  %v985_v16 = vpop.f32.mrb[1].mxu1  ;;  %v335_v17 = vpop.f32.mrb[2].mxu0 }
  0xe9   : > { %v401_v18 = vpop.f32.mrb[2].mxu1  ;;  %v1173_v19 = vpack.c.bf16 %v333_v13, %v333_v13  ;;  %v978_v20 = vpop.f32.mrb[3].mxu0 }
  0xea   : > { %v986_v21 = vpop.f32.mrb[3].mxu1  ;;  %v405_v22 = vpack.c.bf16 %v399_v15, %v399_v15 }
  0xeb   : > { %632 = vrot.lane.b32.xlu1 %v1173_v19, %s1082_s18  ;;  %520 = vrot.lane.b32.xlu0 %v1173_v19, %s1083_s19  ;;  %v411_v23 = vsel %vm406_vm2, %v1173_v19, 0 }
  0xec   : > { %988 = vmatpush3.bf16.xpose.msra.mxu0 %v411_v23 }
  0xed   : > { %999 = vmatprep.subr.bf16.mxu0 %v1080_v1 }
  0xef   : > { %630 = vrot.lane.b32.xlu1 %v405_v22, %s1083_s19  ;;  %518 = vrot.lane.b32.xlu0 %v405_v22, %s1084_s20 }
  0xf3   : > { %742 = vrot.lane.b32.xlu1 %v405_v22, %s1085_s23  ;;  %744 = vrot.lane.b32.xlu0 %v1173_v19, %s1086_s24 }
  0xf4   : > { %990 = vmatmul.mubr.msk.bf16.vlgmr.msra.gmra.mrb[4].mxu0 %vm406_vm2, %v405_v22 }
  0xf5   : > { %1001 = vmatprep.mubr.msk.bf16.mxu0 %vm1081_vm0, %v1080_v1 }
 0x15d   : > { %v521_v24 = vpop.permute.xlu0 %520  ;;  %v633_v26 = vpop.permute.xlu1 %632 }
 0x15e   : > { %v526_v25 = vsel %vm406_vm2, %v521_v24, 0  ;;  %v638_v28 = vsel %vm406_vm2, %v633_v26, 0 }
 0x15f   : > { %1000 = vmatpush3.bf16.xpose.msra.mxu0 %v526_v25 }
 0x160   : > { %1011 = vmatprep.subr.bf16.mxu0 %v1080_v1 }
 0x161   : > { %v519_v27 = vpop.permute.xlu0 %518  ;;  %v631_v30 = vpop.permute.xlu1 %630 }
 0x165   : > { %v745_v29 = vpop.permute.xlu0 %744  ;;  %v743_v32 = vpop.permute.xlu1 %742 }
 0x166   : > { %1002 = vmatmul.mubr.msk.bf16.vlgmr.msra.gmra.mrb[8].mxu0 %vm406_vm2, %v519_v27  ;;  %v750_v31 = vsel %vm406_vm2, %v745_v29, 0 }
 0x167   : > { %1012 = vmatpush3.bf16.xpose.msra.mxu0 %v638_v28  ;;  %1013 = vmatprep.mubr.msk.bf16.mxu0 %vm1081_vm0, %v1080_v1 }
 0x168   : > { %1023 = vmatprep.subr.bf16.mxu0 %v1080_v1 }
 0x16e   : > { %1014 = vmatmul.mubr.msk.bf16.vlgmr.msra.gmra.mrb[12].mxu0 %vm406_vm2, %v631_v30 }
 0x16f   : > { %1024 = vmatpush3.bf16.xpose.msra.mxu0 %v750_v31  ;;  %1025 = vmatprep.mubr.msk.bf16.mxu0 %vm1081_vm0, %v1080_v1 }
 0x176   : > { %1026 = vmatmul.mubr.msk.bf16.vlgmr.msra.gmra.mrb[16].mxu0 %vm406_vm2, %v743_v32 }
 0x1c7   : > { %v447_v33 = vpop.f32.mrb[4].mxu0 }
 0x1c8   : > { %v453_v34 = vmul.f32 0.35355338, %v447_v33  ;;  %v991_v35 = vpop.f32.mrb[5].mxu0 }
 0x1c9   : > { %v450_v36 = vpop.f32.mrb[6].mxu0 }
 0x1ca   : > { %v992_v37 = vpop.f32.mrb[7].mxu0  ;;  %v454_v38 = vsel %vm406_vm2, %v453_v34, -inf }
 0x1cb   : > { %455 = vmax.xlane.f32.xlu0 %v454_v38 }
 0x239   : > { %v562_v39 = vpop.f32.mrb[8].mxu0 }
 0x23a   : > { %v568_v40 = vmul.f32 0.35355338, %v562_v39  ;;  %v1003_v41 = vpop.f32.mrb[9].mxu0 }
 0x23b   : > { %v565_v42 = vpop.f32.mrb[10].mxu0 }
 0x23c   : > { %v1004_v43 = vpop.f32.mrb[11].mxu0  ;;  %v569_v44 = vsel %vm406_vm2, %v568_v40, -inf }
 0x23d   : > { %570 = vmax.xlane.f32.xlu1 %v569_v44 }
 0x241   : > { %v674_v45 = vpop.f32.mrb[12].mxu0 }
 0x242   : > { %v680_v46 = vmul.f32 0.35355338, %v674_v45  ;;  %v1015_v47 = vpop.f32.mrb[13].mxu0 }
 0x243   : > { %v677_v48 = vpop.f32.mrb[14].mxu0 }
 0x244   : > { %v1016_v49 = vpop.f32.mrb[15].mxu0  ;;  %v681_v50 = vsel %vm406_vm2, %v680_v46, -inf }
 0x245   : > { %682 = vmax.xlane.f32.xlu0 %v681_v50 }
 0x249   : > { %v786_v51 = vpop.f32.mrb[16].mxu0 }
 0x24a   : > { %v792_v52 = vmul.f32 0.35355338, %v786_v51  ;;  %v1027_v53 = vpop.f32.mrb[17].mxu0 }
 0x24b   : > { %v789_v54 = vpop.f32.mrb[18].mxu0 }
 0x24c   : > { %v1028_v55 = vpop.f32.mrb[19].mxu0  ;;  %v793_v56 = vsel %vm406_vm2, %v792_v52, -inf }
 0x24d   : > { %794 = vmax.xlane.f32.xlu0 %v793_v56 }
 0x258   : > { %v456_v57 = vpop.xlane.xlu0 %455 }
 0x259   : > { %v457_v58 = vsub.f32 %v453_v34, %v456_v57 }
 0x25b   : > { %v458_v59 = vmul.f32 1.442695, %v457_v58 }
 0x25d   : > { %1056 = vpow2.f32 %v458_v59 }
 0x267   : > { %v1057_v60 = vpop.eup %1056 }
 0x268   : > { %v460_v61 = vsel %vm406_vm2, %v1057_v60, 0.0 }
 0x269   : > { %461 = vadd.xlane.f32.xlu1 %v460_v61 }
 0x27a   : > { %467 = vrot.lane.b32.xlu1 %v1173_v19, %s1084_s20 }
 0x2ca   : > { %v571_v62 = vpop.xlane.xlu1 %570 }
 0x2cb   : > { %v572_v63 = vsub.f32 %v568_v40, %v571_v62 }
 0x2cd   : > { %v573_v0 = vmul.f32 1.442695, %v572_v63 }
 0x2cf   : > { %1058 = vpow2.f32 %v573_v0 }
 0x2d2   : > { %v683_v2 = vpop.xlane.xlu0 %682 }
 0x2d3   : > { %v684_v3 = vsub.f32 %v680_v46, %v683_v2 }
 0x2d5   : > { %v685_v4 = vmul.f32 1.442695, %v684_v3 }
 0x2d7   : > { %1060 = vpow2.f32 %v685_v4 }
 0x2d9   : > { %v1059_v5 = vpop.eup %1058 }
 0x2da   : > { %v795_v6 = vpop.xlane.xlu0 %794  ;;  %v575_v7 = vsel %vm406_vm2, %v1059_v5, 0.0 }
 0x2db   : > { %v796_v8 = vsub.f32 %v792_v52, %v795_v6  ;;  %576 = vadd.xlane.f32.xlu0 %v575_v7 }
 0x2dd   : > { %v797_v9 = vmul.f32 1.442695, %v796_v8 }
 0x2df   : > { %1062 = vpow2.f32 %v797_v9 }
 0x2e1   : > { %v1061_v10 = vpop.eup %1060 }
 0x2e2   : > { %v687_v11 = vsel %vm406_vm2, %v1061_v10, 0.0 }
 0x2e3   : > { %688 = vadd.xlane.f32.xlu1 %v687_v11 }
 0x2e9   : > { %v1063_v12 = vpop.eup %1062 }
 0x2ea   : > { %v799_v13 = vsel %vm406_vm2, %v1063_v12, 0.0 }
 0x2eb   : > { %800 = vadd.xlane.f32.xlu0 %v799_v13 }
 0x2f4   : > { %693 = vrot.lane.b32.xlu1 %v1173_v19, %s1087_s25 }
 0x2f6   : > { %v462_v14 = vpop.xlane.xlu1 %461 }
 0x2f7   : > { %1064 = vrcp.f32 %v462_v14 }
 0x2f8   : > { %805 = vrot.lane.b32.xlu1 %v1173_v19, %s1088_s26 }
 0x2fa   : > { %v468_v15 = vpop.permute.xlu1 %467 }
 0x2fb   : > { %v474_v16 = vsel %vm472_vm3, %v468_v15, 0 }
 0x2fc   : > { %994 = vmatpush3.bf16.msra.mxu1 %v474_v16 }
 0x2fd   : > { %1005 = vmatprep.subr.bf16.mxu1 %v1080_v1 }
 0x301   : > { %v1065_v17 = vpop.eup %1064  ;;  %581 = vrot.lane.b32.xlu0 %v1173_v19, %s1085_s23 }
 0x302   : > { %v464_v18 = vmul.f32 %v1065_v17, %v1057_v60 }
 0x304   : > { %v465_v20 = vpack.c.bf16 %v464_v18, %v464_v18 }
 0x306   : > { %996 = vmatmul.mubr.msk.bf16.vlgmr.msra.gmra.mrb[4].mxu1 %vm406_vm2, %v465_v20 }
 0x307   : > { %1007 = vmatprep.mubr.msk.bf16.mxu1 %vm1081_vm0, %v1080_v1 }
 0x368   : > { %v577_v21 = vpop.xlane.xlu0 %576 }
 0x369   : > { %1066 = vrcp.f32 %v577_v21 }
 0x370   : > { %v689_v22 = vpop.xlane.xlu1 %688 }
 0x371   : > { %1068 = vrcp.f32 %v689_v22 }
 0x373   : > { %v1067_v23 = vpop.eup %1066 }
 0x374   : > { %v579_v25 = vmul.f32 %v1067_v23, %v1059_v5  ;;  %v694_v28 = vpop.permute.xlu1 %693 }
 0x375   : > { %v699_v30 = vsel %vm472_vm3, %v694_v28, 0 }
 0x376   : > { %v580_v19 = vpack.c.bf16 %v579_v25, %v579_v25 }
 0x378   : > { %v801_v24 = vpop.xlane.xlu0 %800  ;;  %v806_v32 = vpop.permute.xlu1 %805 }
 0x379   : > { %1070 = vrcp.f32 %v801_v24  ;;  %v811_v35 = vsel %vm472_vm3, %v806_v32, 0 }
 0x37b   : > { %v1069_v29 = vpop.eup %1068 }
 0x37c   : > { %v582_v26 = vpop.permute.xlu0 %581  ;;  %v691_v31 = vmul.f32 %v1069_v29, %v1061_v10 }
 0x37d   : > { %v587_v27 = vsel %vm472_vm3, %v582_v26, 0 }
 0x37e   : > { %1006 = vmatpush3.bf16.msra.mxu1 %v587_v27  ;;  %v692_v33 = vpack.c.bf16 %v691_v31, %v691_v31 }
 0x37f   : > { %1017 = vmatprep.subr.bf16.mxu1 %v1080_v1 }
 0x381   : > { %1008 = vmatmul.mubr.msk.bf16.vlgmr.msra.gmra.mrb[8].mxu1 %vm406_vm2, %v580_v19 }
 0x382   : > { %1018 = vmatpush3.bf16.msra.mxu1 %v699_v30  ;;  %1019 = vmatprep.mubr.msk.bf16.mxu1 %vm1081_vm0, %v1080_v1 }
 0x383   : > { %1029 = vmatprep.subr.bf16.mxu1 %v1080_v1  ;;  %v1071_v34 = vpop.eup %1070 }
 0x384   : > { %v803_v36 = vmul.f32 %v1071_v34, %v1063_v12 }
 0x386   : > { %v804_v37 = vpack.c.bf16 %v803_v36, %v803_v36 }
 0x389   : > { %1020 = vmatmul.mubr.msk.bf16.vlgmr.msra.gmra.mrb[12].mxu1 %vm406_vm2, %v692_v33 }
 0x38a   : > { %1030 = vmatpush3.bf16.msra.mxu1 %v811_v35  ;;  %1031 = vmatprep.mubr.msk.bf16.mxu1 %vm1081_vm0, %v1080_v1 }
 0x391   : > { %1032 = vmatmul.mubr.msk.bf16.vlgmr.msra.gmra.mrb[16].mxu1 %vm406_vm2, %v804_v37 }
 0x3d9   : > { %v510_v38 = vpop.f32.mrb[4].mxu1 }
 0x3da   : > { %516 = vst.msk [vmem:[%s265_s30] sm:$0xff] %vm406_vm2, %v510_v38  ;;  %v997_v39 = vpop.f32.mrb[5].mxu1 }
 0x3db   : > { %v513_v40 = vpop.f32.mrb[6].mxu1 }
 0x3dc   : > { %v998_v41 = vpop.f32.mrb[7].mxu1 }
 0x454   : > { %v623_v42 = vpop.f32.mrb[8].mxu1 }
 0x455   : > { %629 = vst.msk [vmem:[%s265_s30 + $0x8] sm:$0xff] %vm406_vm2, %v623_v42  ;;  %v1009_v43 = vpop.f32.mrb[9].mxu1 }
 0x456   : > { %v626_v1 = vpop.f32.mrb[10].mxu1 }
 0x457   : > { %v1010_v44 = vpop.f32.mrb[11].mxu1 }
 0x45c   : > { %v735_v45 = vpop.f32.mrb[12].mxu1 }
 0x45d   : > { %741 = vst.msk [vmem:[%s265_s30 + $0x10] sm:$0xff] %vm406_vm2, %v735_v45  ;;  %v1021_v46 = vpop.f32.mrb[13].mxu1 }
 0x45e   : > { %v738_v47 = vpop.f32.mrb[14].mxu1 }
 0x45f   : > { %v1022_v48 = vpop.f32.mrb[15].mxu1 }
 0x464   : > { %v847_v49 = vpop.f32.mrb[16].mxu1 }
 0x465   : > { %853 = vst.msk [vmem:[%s265_s30 + $0x18] sm:$0xff] %vm406_vm2, %v847_v49  ;;  %v1033_v50 = vpop.f32.mrb[17].mxu1 }
 0x466   : > { %v850_v51 = vpop.f32.mrb[18].mxu1 }
 0x467   : > { %v1034_v52 = vpop.f32.mrb[19].mxu1 }
 0x468 PF: > { %s16_s21 = sadd.s32 1, %s1078_s21  }
 0x469   : > { %p13_p4 = scmp.ge.s32.totalorder %s16_s21, 4  }
 0x46b   :  { %15 = sbr.rel (!%p13_p4) target bundleno = 1 (0x1), region = 77 }

</bundles_post_ra>
